<compile_context>
chip_gen: v6e
topology: v6e:2x2x1
jax: 0.10.0
libtpu: 0.0.40
codegen_flags: <defaults>
</compile_context>

<pallas_src>
import functools
import math

import numpy as np
import jax
import jax.numpy as jnp
from jax import lax
from jax.experimental import pallas as pl
from jax.experimental.pallas import tpu as pltpu


def _cdiv(a, b):
    return (a + b - 1) // b


def _round_up(a, b):
    return _cdiv(a, b) * b


# ----------------------------------------------------------------------------
# Pallas kernel: in-VMEM framing + single full-K DFT matmul + loss partials
# ----------------------------------------------------------------------------
def _stft_loss_kernel(xy_ref, xh_ref, basis_ref, out_ref, frames_ref, acc_ref,
                      *, tf, n_frames, n_freq, stride, k_h, g, nf_pad,
                      slab_rows, mxu_dtype):
    j = pl.program_id(1)

    @pl.when(j == 0)
    def _init():
        acc_ref[...] = jnp.zeros_like(acc_ref)

    # ---- build the stacked (y | y_hat) frame matrix ONCE per tile ----------
    # frames_ref : (2*tf, n_fft) VMEM scratch, rows [0,tf) = y frames,
    # rows [tf,2tf) = y_hat frames.  Frame (j*tf + f), sample q*g + r
    #   <->  X[b, (j*tf + f)*stride + q, r]   with X the (rows, g) chunking.
    row0 = pl.multiple_of(j * (tf * stride), 8)
    if stride == 1:
        # hop divides n_fft: one aligned slab load per signal, then k_h cheap
        # static sublane-shifted slices stored at lane offsets q*g
        # (multiples of 128 whenever 128 | hop -> unmasked stores).
        slab_y = xy_ref[0, pl.ds(row0, slab_rows), :]
        slab_h = xh_ref[0, pl.ds(row0, slab_rows), :]
        for q in range(k_h):
            frames_ref[:tf, q * g:(q + 1) * g] = (
                slab_y[q:q + tf, :].astype(mxu_dtype))
            frames_ref[tf:, q * g:(q + 1) * g] = (
                slab_h[q:q + tf, :].astype(mxu_dtype))
    else:
        # TODO(synk): general hop (does not divide n_fft) uses strided sublane
        # slices - correct but slow; typical STFT configs never hit this path.
        for q in range(k_h):
            sl = pl.ds(row0 + q, tf, stride)
            frames_ref[:tf, q * g:(q + 1) * g] = xy_ref[0, sl, :].astype(mxu_dtype)
            frames_ref[tf:, q * g:(q + 1) * g] = xh_ref[0, sl, :].astype(mxu_dtype)

    # ---- single full-K MXU contraction (K = n_fft) --------------------------
    s = jnp.dot(frames_ref[...], basis_ref[...],
                preferred_element_type=jnp.float32)     # (2*tf, 2*nf_pad) f32
    ry, iy = s[:tf, :nf_pad], s[:tf, nf_pad:]
    rh, ih = s[tf:, :nf_pad], s[tf:, nf_pad:]

    # Mask frame rows beyond n_frames (last tile reads zero-padded samples)
    # and, for the log term only, the zero-padded frequency lanes.
    frame_ids = j * tf + lax.broadcasted_iota(jnp.int32, (tf, 1), 0)
    m = (frame_ids < n_frames).astype(jnp.float32)                   # (tf, 1)
    lane_m = (lax.broadcasted_iota(jnp.int32, (1, nf_pad), 1)
              < n_freq).astype(jnp.float32)                          # (1, nf_pad)

    dr = ry - rh
    di = iy - ih
    p_y = ry * ry + iy * iy
    p_h = rh * rh + ih * ih
    diff_sq = jnp.sum(m * (dr * dr + di * di))    # ||S_y - S_yhat||_F^2 partial
    ref_sq = jnp.sum(m * p_y)                     # ||S_y||_F^2 partial
    # |log(|Sy|+eps) - log(|Sh|+eps)|  ~=  0.5*|log((|Sy|^2+eps^2)/(|Sh|^2+eps^2))|
    # one log + one (approx, EUP) reciprocal instead of 2 sqrt + div + 2 log.
    eps2 = jnp.float32(1e-14)
    ratio = (p_y + eps2) * pl.reciprocal(p_h + eps2, approx=True)
    l1_sum = 0.5 * jnp.sum((m * lane_m) * jnp.abs(jnp.log(ratio)))

    lane = lax.broadcasted_iota(jnp.int32, acc_ref.shape, 1)
    acc_ref[...] += (jnp.where(lane == 0, diff_sq, 0.0)
                     + jnp.where(lane == 1, ref_sq, 0.0)
                     + jnp.where(lane == 2, l1_sum, 0.0))

    @pl.when(j == pl.num_programs(1) - 1)
    def _finalize():
        out_ref[0] = acc_ref[...]     # per-batch lane-dense writeback


# ----------------------------------------------------------------------------
# Host-side glue: chunked-signal layout + windowed DFT basis + pallas_call
# ----------------------------------------------------------------------------
def _dft_basis(n_fft, win_length, n_freq, nf_pad, dtype):
    """[cos | -sin] one-sided DFT basis with a rect window of length
    win_length centered in n_fft; frequency axis zero-padded to nf_pad."""
    window = np.zeros(n_fft, dtype=np.float64)
    left = (n_fft - win_length) // 2
    window[left:left + win_length] = 1.0
    n = np.arange(n_fft)[:, None]
    k = np.arange(n_freq)[None, :]
    ang = 2.0 * np.pi * n * k / n_fft
    basis = np.zeros((n_fft, 2 * nf_pad), dtype=np.float64)
    basis[:, :n_freq] = window[:, None] * np.cos(ang)
    basis[:, nf_pad:nf_pad + n_freq] = -window[:, None] * np.sin(ang)
    return jnp.asarray(basis, dtype=dtype)


def _stft_loss_sums(y_hat, y, n_fft, hop, win, mxu_dtype):
    """Returns (sum|Sy-Sh|^2, sum|Sy|^2, sum|log-mag diff|, n_frames, n_freq)."""
    b, t = y.shape
    pad = n_fft // 2
    yp = jnp.pad(y, ((0, 0), (pad, pad)), mode="reflect")
    hp = jnp.pad(y_hat, ((0, 0), (pad, pad)), mode="reflect")
    length = t + 2 * pad
    n_frames = 1 + (length - n_fft) // hop
    n_freq = n_fft // 2 + 1
    nf_pad = _round_up(n_freq, 128)            # lane-dense MXU output tiles

    g = math.gcd(n_fft, hop)                   # chunk (lane) width of X
    stride = hop // g                          # frame-to-frame row stride
    k_h = n_fft // g                           # chunks per frame

    max_tf = 256 if n_fft < 1024 else 128      # smaller tiles for big FFTs
    tf = min(max_tf, _round_up(n_frames, 8))   # frames per tile (multiple of 8)
    n_tiles = _cdiv(n_frames, tf)
    slab_rows = _round_up(tf * stride + (k_h - 1), 8)
    if stride == 1:
        rows = (n_tiles - 1) * tf + slab_rows
    else:
        rows = _round_up((n_tiles * tf - 1) * stride + k_h, 8)
    total = rows * g

    def chunk(xp):
        if total > length:
            xp = jnp.pad(xp, ((0, 0), (0, total - length)))
        else:
            xp = xp[:, :total]
        # Free row-major reshape: X[b, m, r] == xp[b, m*g + r]
        return xp.reshape(b, rows, g)

    xy = chunk(yp)
    xh = chunk(hp)
    basis = _dft_basis(n_fft, win, n_freq, nf_pad, mxu_dtype)

    # Explicit VMEM budget (scoped defaults are 16/32 MiB on v5e/v6e; v7x has
    # only 64 MiB physical, so cap below that).
    item = jnp.dtype(mxu_dtype).itemsize
    footprint = (2 * 2 * rows * g * 4                 # two signals x 2 buffers
                 + 2 * n_fft * 2 * nf_pad * item      # basis x 2 buffers
                 + 2 * tf * n_fft * item              # frames scratch
                 + 4 * 2 * tf * 2 * nf_pad * 4        # matmul result + epilogue
                 + (2 << 20))
    vmem_limit = int(min(max(int(footprint * 1.5), 32 << 20), 60 << 20))

    kernel = functools.partial(
        _stft_loss_kernel, tf=tf, n_frames=n_frames, n_freq=n_freq,
        stride=stride, k_h=k_h, g=g, nf_pad=nf_pad, slab_rows=slab_rows,
        mxu_dtype=mxu_dtype)

    res = pl.pallas_call(
        kernel,
        out_shape=jax.ShapeDtypeStruct((b, 8, 128), jnp.float32),
        grid=(b, n_tiles),
        in_specs=[
            # per-batch chunked signal stays VMEM-resident across its tiles
            pl.BlockSpec((1, rows, g), lambda bi, ji: (bi, 0, 0)),
            pl.BlockSpec((1, rows, g), lambda bi, ji: (bi, 0, 0)),
            # constant windowed-DFT basis, fetched once.
            # TODO(synk): pipeline_mode=pl.Buffered(1) here would halve the
            # basis VMEM (useful on v7x's 64 MiB) once that path is hardened.
            pl.BlockSpec((n_fft, 2 * nf_pad), lambda bi, ji: (0, 0)),
        ],
        # one lane-dense block per batch, written at that batch's last tile
        out_specs=pl.BlockSpec((1, 8, 128), lambda bi, ji: (bi, 0, 0)),
        scratch_shapes=[pltpu.VMEM((2 * tf, k_h * g), mxu_dtype),   # frames
                        pltpu.VMEM((8, 128), jnp.float32)],          # partials
        compiler_params=pltpu.CompilerParams(
            dimension_semantics=("parallel", "arbitrary"),
            vmem_limit_bytes=vmem_limit),
    )(xy, xh, basis)

    diff_sq = jnp.sum(res[:, 0, 0])
    ref_sq = jnp.sum(res[:, 0, 1])
    l1_sum = jnp.sum(res[:, 0, 2])
    return diff_sq, ref_sq, l1_sum, n_frames, n_freq


class MultiResolutionSTFTLoss:
    """JAX/Pallas port of the PyTorch MultiResolutionSTFTLoss forward."""

    def __init__(self, fft_sizes, hop_sizes, win_lengths,
                 compute_dtype=jnp.bfloat16):
        for n_fft, win in zip(fft_sizes, win_lengths):
            assert win <= n_fft, "torch.stft requires win_length <= n_fft"
        self.fft_sizes = fft_sizes
        self.hop_sizes = hop_sizes
        self.win_lengths = win_lengths
        # bf16 MXU inputs + f32 accumulation is the fast path on all TPU
        # generations; pass jnp.float32 for reference-exact (slower) compute.
        self.compute_dtype = compute_dtype

    def __call__(self, y_hat, y):
        b = y.shape[0]
        loss = jnp.float32(0.0)
        # TODO(synk): the three resolutions still run as separate pallas_calls;
        # fusing them (resolution grid axis + scalar-prefetched params) would
        # amortize launch/pipeline ramp and read the signal from HBM once.
        for n_fft, hop, win in zip(self.fft_sizes, self.hop_sizes,
                                   self.win_lengths):
            diff_sq, ref_sq, l1_sum, n_frames, n_freq = _stft_loss_sums(
                y_hat, y, n_fft, hop, win, self.compute_dtype)
            sc_loss = jnp.sqrt(diff_sq) / jnp.sqrt(ref_sq)
            mag_loss = l1_sum / (b * n_freq * n_frames)   # F.l1_loss 'mean'
            loss = loss + sc_loss + mag_loss
        return loss / len(self.fft_sizes)


# ----------------------------------------------------------------------------
# Pure-JAX reference (jnp.fft.rfft) for a correctness sanity check
# ----------------------------------------------------------------------------
def _reference_loss(y_hat, y, fft_sizes, hop_sizes, win_lengths):
    def stft(x, n_fft, hop, win):
        pad = n_fft // 2
        xp = jnp.pad(x, ((0, 0), (pad, pad)), mode="reflect")
        n_frames = 1 + (xp.shape[1] - n_fft) // hop
        idx = jnp.arange(n_frames)[:, None] * hop + jnp.arange(n_fft)[None, :]
        frames = xp[:, idx]
        window = jnp.zeros(n_fft, jnp.float32).at[
            (n_fft - win) // 2:(n_fft - win) // 2 + win].set(1.0)
        return jnp.fft.rfft(frames * window, n=n_fft, axis=-1)

    total = jnp.float32(0.0)
    for n_fft, hop, win in zip(fft_sizes, hop_sizes, win_lengths):
        sy = stft(y, n_fft, hop, win)
        sh = stft(y_hat, n_fft, hop, win)
        sc = (jnp.sqrt(jnp.sum(jnp.abs(sy - sh) ** 2)) /
              jnp.sqrt(jnp.sum(jnp.abs(sy) ** 2)))
        mag = jnp.mean(jnp.abs(jnp.log(jnp.abs(sy) + 1e-7) -
                               jnp.log(jnp.abs(sh) + 1e-7)))
        total = total + sc + mag
    return total / len(fft_sizes)


if __name__ == "__main__":
    key = jax.random.PRNGKey(0)
    k1, k2 = jax.random.split(key)

    B, T = 2, 4096
    y = jax.random.normal(k1, (B, T), dtype=jnp.float32)
    y_hat = y + 0.1 * jax.random.normal(k2, (B, T), dtype=jnp.float32)

    # Valid, realistic multi-resolution settings (the PyTorch defaults with
    # win_length > n_fft are rejected by torch.stft itself).  hop % 128 == 0
    # keeps the in-kernel signal chunks lane-dense (fast path).
    fft_sizes = [512, 1024, 2048]
    hop_sizes = [128, 256, 512]
    win_lengths = [400, 800, 1600]

    ref = jax.block_until_ready(
        _reference_loss(y_hat, y, fft_sizes, hop_sizes, win_lengths))

    # Reference-accuracy path: f32 MXU inputs.
    loss_f32 = MultiResolutionSTFTLoss(fft_sizes, hop_sizes, win_lengths,
                                       compute_dtype=jnp.float32)
    out_f32 = jax.block_until_ready(loss_f32(y_hat, y))
    assert np.isfinite(float(out_f32))
    assert np.allclose(float(out_f32), float(ref), rtol=2e-2, atol=2e-3), \
        (float(out_f32), float(ref))

    # Default fast path: bf16 MXU inputs, f32 accumulation (looser tolerance
    # since the audio and DFT basis are rounded to bf16 before the matmul).
    loss_bf16 = MultiResolutionSTFTLoss(fft_sizes, hop_sizes, win_lengths)
    out_bf16 = jax.block_until_ready(loss_bf16(y_hat, y))
    assert np.isfinite(float(out_bf16))
    assert np.allclose(float(out_bf16), float(ref), rtol=7.5e-2, atol=5e-3), \
        (float(out_bf16), float(ref))

    print("KERNEL_OK")
</pallas_src>

<mosaic_0001>
module attributes {stable_mosaic.version = 11 : i64} {
  func.func @_stft_loss_kernel(%arg0: i32, %arg1: i32, %arg2: memref<1x48x128xf32, #tpu.memory_space<vmem>>, %arg3: memref<1x48x128xf32, #tpu.memory_space<vmem>>, %arg4: memref<512x768xf32, #tpu.memory_space<vmem>>, %arg5: memref<1x8x128xf32, #tpu.memory_space<vmem>>, %arg6: memref<80x512xf32, #tpu.memory_space<vmem>>, %arg7: memref<8x128xf32, #tpu.memory_space<vmem>>) attributes {dimension_semantics = [#tpu.dimension_semantics<parallel>, #tpu.dimension_semantics<arbitrary>], iteration_bounds = array<i64: 2, 1>, scalar_prefetch = 0 : i64, scratch_operands = 2 : i64, tpu.core_type = #tpu.core_type<tc>, window_params = [{transform_indices = @transform_0, window_bounds = array<i64: 1, 48, 128>}, {transform_indices = @transform_1, window_bounds = array<i64: 1, 48, 128>}, {pipeline_mode = #tpu.pipeline_mode<synchronous>, transform_indices = @transform_2, window_bounds = array<i64: 512, 768>}, {transform_indices = @transform_3, window_bounds = array<i64: 1, 8, 128>}]} {
    %c0_i32 = arith.constant 0 : i32
    %0 = arith.cmpi eq, %arg1, %c0_i32 : i32
    %1 = arith.extui %0 : i1 to i32
    %c0_i32_0 = arith.constant 0 : i32
    %2 = arith.cmpi ne, %1, %c0_i32_0 : i32
    scf.if %2 {
      %cst_37 = arith.constant 0.000000e+00 : f32
      %111 = vector.broadcast %cst_37 : f32 to vector<8x128xf32>
      %c0_38 = arith.constant 0 : index
      %c0_39 = arith.constant 0 : index
      %112 = vector.load %arg7[%c0_38, %c0_39] : memref<8x128xf32, #tpu.memory_space<vmem>>, vector<8x128xf32>
      tpu.vector_store %arg7[%c0_38, %c0_39], %111 {strides = array<i32>} : memref<8x128xf32, #tpu.memory_space<vmem>>, vector<8x128xf32>,
    } else {
    }
    %c40_i32 = arith.constant 40 : i32
    %3 = arith.muli %arg1, %c40_i32 : i32
    %4 = tpu.assume_multiple %3, 8 : i32
    %c0 = arith.constant 0 : index
    %5 = arith.index_cast %4 : i32 to index
    %c0_1 = arith.constant 0 : index
    %6 = vector.load %arg2[%c0, %5, %c0_1] : memref<1x48x128xf32, #tpu.memory_space<vmem>>, vector<1x48x128xf32>
    %7 = vector.shape_cast %6 : vector<1x48x128xf32> to vector<48x128xf32>
    %c0_2 = arith.constant 0 : index
    %8 = arith.index_cast %4 : i32 to index
    %c0_3 = arith.constant 0 : index
    %9 = vector.load %arg3[%c0_2, %8, %c0_3] : memref<1x48x128xf32, #tpu.memory_space<vmem>>, vector<1x48x128xf32>
    %10 = vector.shape_cast %9 : vector<1x48x128xf32> to vector<48x128xf32>
    %11 = vector.extract_strided_slice %7 {offsets = [0, 0], sizes = [40, 128], strides = [1, 1]} : vector<48x128xf32> to vector<40x128xf32>
    %c0_4 = arith.constant 0 : index
    %c0_5 = arith.constant 0 : index
    %12 = vector.load %arg6[%c0_4, %c0_5] : memref<80x512xf32, #tpu.memory_space<vmem>>, vector<40x128xf32>
    tpu.vector_store %arg6[%c0_4, %c0_5], %11 {strides = array<i32>} : memref<80x512xf32, #tpu.memory_space<vmem>>, vector<40x128xf32>,
    %13 = vector.extract_strided_slice %10 {offsets = [0, 0], sizes = [40, 128], strides = [1, 1]} : vector<48x128xf32> to vector<40x128xf32>
    %c40 = arith.constant 40 : index
    %c0_6 = arith.constant 0 : index
    %14 = vector.load %arg6[%c40, %c0_6] : memref<80x512xf32, #tpu.memory_space<vmem>>, vector<40x128xf32>
    tpu.vector_store %arg6[%c40, %c0_6], %13 {strides = array<i32>} : memref<80x512xf32, #tpu.memory_space<vmem>>, vector<40x128xf32>,
    %15 = vector.extract_strided_slice %7 {offsets = [1, 0], sizes = [40, 128], strides = [1, 1]} : vector<48x128xf32> to vector<40x128xf32>
    %c0_7 = arith.constant 0 : index
    %c128 = arith.constant 128 : index
    %16 = vector.load %arg6[%c0_7, %c128] : memref<80x512xf32, #tpu.memory_space<vmem>>, vector<40x128xf32>
    tpu.vector_store %arg6[%c0_7, %c128], %15 {strides = array<i32>} : memref<80x512xf32, #tpu.memory_space<vmem>>, vector<40x128xf32>,
    %17 = vector.extract_strided_slice %10 {offsets = [1, 0], sizes = [40, 128], strides = [1, 1]} : vector<48x128xf32> to vector<40x128xf32>
    %c40_8 = arith.constant 40 : index
    %c128_9 = arith.constant 128 : index
    %18 = vector.load %arg6[%c40_8, %c128_9] : memref<80x512xf32, #tpu.memory_space<vmem>>, vector<40x128xf32>
    tpu.vector_store %arg6[%c40_8, %c128_9], %17 {strides = array<i32>} : memref<80x512xf32, #tpu.memory_space<vmem>>, vector<40x128xf32>,
    %19 = vector.extract_strided_slice %7 {offsets = [2, 0], sizes = [40, 128], strides = [1, 1]} : vector<48x128xf32> to vector<40x128xf32>
    %c0_10 = arith.constant 0 : index
    %c256 = arith.constant 256 : index
    %20 = vector.load %arg6[%c0_10, %c256] : memref<80x512xf32, #tpu.memory_space<vmem>>, vector<40x128xf32>
    tpu.vector_store %arg6[%c0_10, %c256], %19 {strides = array<i32>} : memref<80x512xf32, #tpu.memory_space<vmem>>, vector<40x128xf32>,
    %21 = vector.extract_strided_slice %10 {offsets = [2, 0], sizes = [40, 128], strides = [1, 1]} : vector<48x128xf32> to vector<40x128xf32>
    %c40_11 = arith.constant 40 : index
    %c256_12 = arith.constant 256 : index
    %22 = vector.load %arg6[%c40_11, %c256_12] : memref<80x512xf32, #tpu.memory_space<vmem>>, vector<40x128xf32>
    tpu.vector_store %arg6[%c40_11, %c256_12], %21 {strides = array<i32>} : memref<80x512xf32, #tpu.memory_space<vmem>>, vector<40x128xf32>,
    %23 = vector.extract_strided_slice %7 {offsets = [3, 0], sizes = [40, 128], strides = [1, 1]} : vector<48x128xf32> to vector<40x128xf32>
    %c0_13 = arith.constant 0 : index
    %c384 = arith.constant 384 : index
    %24 = vector.load %arg6[%c0_13, %c384] : memref<80x512xf32, #tpu.memory_space<vmem>>, vector<40x128xf32>
    tpu.vector_store %arg6[%c0_13, %c384], %23 {strides = array<i32>} : memref<80x512xf32, #tpu.memory_space<vmem>>, vector<40x128xf32>,
    %25 = vector.extract_strided_slice %10 {offsets = [3, 0], sizes = [40, 128], strides = [1, 1]} : vector<48x128xf32> to vector<40x128xf32>
    %c40_14 = arith.constant 40 : index
    %c384_15 = arith.constant 384 : index
    %26 = vector.load %arg6[%c40_14, %c384_15] : memref<80x512xf32, #tpu.memory_space<vmem>>, vector<40x128xf32>
    tpu.vector_store %arg6[%c40_14, %c384_15], %25 {strides = array<i32>} : memref<80x512xf32, #tpu.memory_space<vmem>>, vector<40x128xf32>,
    %c0_16 = arith.constant 0 : index
    %c0_17 = arith.constant 0 : index
    %27 = vector.load %arg6[%c0_16, %c0_17] : memref<80x512xf32, #tpu.memory_space<vmem>>, vector<80x512xf32>
    %c0_18 = arith.constant 0 : index
    %c0_19 = arith.constant 0 : index
    %28 = vector.load %arg4[%c0_18, %c0_19] : memref<512x768xf32, #tpu.memory_space<vmem>>, vector<512x768xf32>
    %cst = arith.constant dense<0.000000e+00> : vector<80x768xf32>
    %29 = tpu.matmul %27, %28, %cst {dimension_numbers = #tpu.dot_dimension_numbers<[1], [0], [0], [1], [0, 0, 1, 1], [], []>} : vector<80x512xf32>, vector<512x768xf32>, vector<80x768xf32> -> vector<80x768xf32>
    %30 = vector.extract_strided_slice %29 {offsets = [0, 0], sizes = [40, 384], strides = [1, 1]} : vector<80x768xf32> to vector<40x384xf32>
    %31 = vector.extract_strided_slice %29 {offsets = [0, 384], sizes = [40, 384], strides = [1, 1]} : vector<80x768xf32> to vector<40x384xf32>
    %32 = vector.extract_strided_slice %29 {offsets = [40, 0], sizes = [40, 384], strides = [1, 1]} : vector<80x768xf32> to vector<40x384xf32>
    %33 = vector.extract_strided_slice %29 {offsets = [40, 384], sizes = [40, 384], strides = [1, 1]} : vector<80x768xf32> to vector<40x384xf32>
    %c40_i32_20 = arith.constant 40 : i32
    %34 = arith.muli %arg1, %c40_i32_20 : i32
    %35 = tpu.iota {dimensions = array<i32: 0>} : vector<40x1xi32>
    %36 = vector.broadcast %34 : i32 to vector<40x1xi32>
    %37 = arith.addi %36, %35 : vector<40x1xi32>
    %c33_i32 = arith.constant 33 : i32
    %38 = vector.broadcast %c33_i32 : i32 to vector<40x1xi32>
    %39 = arith.cmpi slt, %37, %38 : vector<40x1xi32>
    %40 = arith.extui %39 : vector<40x1xi1> to vector<40x1xi32>
    %41 = arith.sitofp %40 : vector<40x1xi32> to vector<40x1xf32>
    %42 = tpu.iota {dimensions = array<i32: 1>} : vector<1x384xi32>
    %c257_i32 = arith.constant 257 : i32
    %43 = vector.broadcast %c257_i32 : i32 to vector<1x384xi32>
    %44 = arith.cmpi slt, %42, %43 : vector<1x384xi32>
    %45 = arith.extui %44 : vector<1x384xi1> to vector<1x384xi32>
    %46 = arith.sitofp %45 : vector<1x384xi32> to vector<1x384xf32>
    %47 = arith.subf %30, %32 : vector<40x384xf32>
    %48 = arith.subf %31, %33 : vector<40x384xf32>
    %49 = arith.mulf %30, %30 : vector<40x384xf32>
    %50 = arith.mulf %31, %31 : vector<40x384xf32>
    %51 = arith.addf %49, %50 : vector<40x384xf32>
    %52 = arith.mulf %32, %32 : vector<40x384xf32>
    %53 = arith.mulf %33, %33 : vector<40x384xf32>
    %54 = arith.addf %52, %53 : vector<40x384xf32>
    %55 = arith.mulf %47, %47 : vector<40x384xf32>
    %56 = arith.mulf %48, %48 : vector<40x384xf32>
    %57 = arith.addf %55, %56 : vector<40x384xf32>
    %58 = vector.broadcast %41 : vector<40x1xf32> to vector<40x384xf32>
    %59 = arith.mulf %58, %57 : vector<40x384xf32>
    %60 = vector.shape_cast %59 : vector<40x384xf32> to vector<1x40x384xf32>
    %cst_21 = arith.constant dense<0.000000e+00> : vector<1xf32>
    %61 = vector.multi_reduction <add>, %60, %cst_21 [1, 2] : vector<1x40x384xf32> to vector<1xf32>
    %62 = vector.shape_cast %61 : vector<1xf32> to vector<1x1x1xf32>
    %63 = vector.extract %62[0, 0, 0] : f32 from vector<1x1x1xf32>
    %64 = vector.broadcast %41 : vector<40x1xf32> to vector<40x384xf32>
    %65 = arith.mulf %64, %51 : vector<40x384xf32>
    %66 = vector.shape_cast %65 : vector<40x384xf32> to vector<1x40x384xf32>
    %cst_22 = arith.constant dense<0.000000e+00> : vector<1xf32>
    %67 = vector.multi_reduction <add>, %66, %cst_22 [1, 2] : vector<1x40x384xf32> to vector<1xf32>
    %68 = vector.shape_cast %67 : vector<1xf32> to vector<1x1x1xf32>
    %69 = vector.extract %68[0, 0, 0] : f32 from vector<1x1x1xf32>
    %cst_23 = arith.constant 9.99999982E-15 : f32
    %70 = vector.broadcast %cst_23 : f32 to vector<40x384xf32>
    %71 = arith.addf %51, %70 : vector<40x384xf32>
    %cst_24 = arith.constant 9.99999982E-15 : f32
    %72 = vector.broadcast %cst_24 : f32 to vector<40x384xf32>
    %73 = arith.addf %54, %72 : vector<40x384xf32>
    %74 = tpu.reciprocal %73 {approx = true} : vector<40x384xf32> -> vector<40x384xf32>
    %75 = arith.mulf %71, %74 : vector<40x384xf32>
    %76 = vector.broadcast %41 : vector<40x1xf32> to vector<40x384xf32>
    %77 = vector.broadcast %46 : vector<1x384xf32> to vector<40x384xf32>
    %78 = arith.mulf %76, %77 : vector<40x384xf32>
    %79 = math.log %75 : vector<40x384xf32>
    %80 = math.absf %79 : vector<40x384xf32>
    %81 = arith.mulf %78, %80 : vector<40x384xf32>
    %82 = vector.shape_cast %81 : vector<40x384xf32> to vector<1x40x384xf32>
    %cst_25 = arith.constant dense<0.000000e+00> : vector<1xf32>
    %83 = vector.multi_reduction <add>, %82, %cst_25 [1, 2] : vector<1x40x384xf32> to vector<1xf32>
    %84 = vector.shape_cast %83 : vector<1xf32> to vector<1x1x1xf32>
    %85 = vector.extract %84[0, 0, 0] : f32 from vector<1x1x1xf32>
    %cst_26 = arith.constant 5.000000e-01 : f32
    %86 = arith.mulf %cst_26, %85 : f32
    %87 = tpu.iota {dimensions = array<i32: 1>} : vector<8x128xi32>
    %c0_27 = arith.constant 0 : index
    %c0_28 = arith.constant 0 : index
    %88 = vector.load %arg7[%c0_27, %c0_28] : memref<8x128xf32, #tpu.memory_space<vmem>>, vector<8x128xf32>
    %c0_i32_29 = arith.constant 0 : i32
    %89 = vector.broadcast %c0_i32_29 : i32 to vector<8x128xi32>
    %90 = arith.cmpi eq, %87, %89 : vector<8x128xi32>
    %cst_30 = arith.constant 0.000000e+00 : f32
    %91 = vector.broadcast %63 : f32 to vector<8x128xf32>
    %92 = vector.broadcast %cst_30 : f32 to vector<8x128xf32>
    %93 = arith.select %90, %91, %92 : vector<8x128xi1>, vector<8x128xf32>
    %c1_i32 = arith.constant 1 : i32
    %94 = vector.broadcast %c1_i32 : i32 to vector<8x128xi32>
    %95 = arith.cmpi eq, %87, %94 : vector<8x128xi32>
    %cst_31 = arith.constant 0.000000e+00 : f32
    %96 = vector.broadcast %69 : f32 to vector<8x128xf32>
    %97 = vector.broadcast %cst_31 : f32 to vector<8x128xf32>
    %98 = arith.select %95, %96, %97 : vector<8x128xi1>, vector<8x128xf32>
    %99 = arith.addf %93, %98 : vector<8x128xf32>
    %c2_i32 = arith.constant 2 : i32
    %100 = vector.broadcast %c2_i32 : i32 to vector<8x128xi32>
    %101 = arith.cmpi eq, %87, %100 : vector<8x128xi32>
    %cst_32 = arith.constant 0.000000e+00 : f32
    %102 = vector.broadcast %86 : f32 to vector<8x128xf32>
    %103 = vector.broadcast %cst_32 : f32 to vector<8x128xf32>
    %104 = arith.select %101, %102, %103 : vector<8x128xi1>, vector<8x128xf32>
    %105 = arith.addf %99, %104 : vector<8x128xf32>
    %106 = arith.addf %88, %105 : vector<8x128xf32>
    %c0_33 = arith.constant 0 : index
    %c0_34 = arith.constant 0 : index
    %107 = vector.load %arg7[%c0_33, %c0_34] : memref<8x128xf32, #tpu.memory_space<vmem>>, vector<8x128xf32>
    tpu.vector_store %arg7[%c0_33, %c0_34], %106 {strides = array<i32>} : memref<8x128xf32, #tpu.memory_space<vmem>>, vector<8x128xf32>,
    %c0_i32_35 = arith.constant 0 : i32
    %108 = arith.cmpi eq, %arg1, %c0_i32_35 : i32
    %109 = arith.extui %108 : i1 to i32
    %c0_i32_36 = arith.constant 0 : i32
    %110 = arith.cmpi ne, %109, %c0_i32_36 : i32
    scf.if %110 {
      %c0_37 = arith.constant 0 : index
      %c0_38 = arith.constant 0 : index
      %111 = vector.load %arg7[%c0_37, %c0_38] : memref<8x128xf32, #tpu.memory_space<vmem>>, vector<8x128xf32>
      %c0_39 = arith.constant 0 : index
      %c0_40 = arith.constant 0 : index
      %c0_41 = arith.constant 0 : index
      %112 = vector.load %arg5[%c0_39, %c0_40, %c0_41] : memref<1x8x128xf32, #tpu.memory_space<vmem>>, vector<1x8x128xf32>
      %113 = vector.shape_cast %112 : vector<1x8x128xf32> to vector<8x128xf32>
      %114 = vector.shape_cast %111 : vector<8x128xf32> to vector<1x8x128xf32>
      tpu.vector_store %arg5[%c0_39, %c0_40, %c0_41], %114 {strides = array<i32>} : memref<1x8x128xf32, #tpu.memory_space<vmem>>, vector<1x8x128xf32>,
    } else {
    }
    return
  }
  func.func @transform_0(%arg0: i32, %arg1: i32) -> (i32, i32, i32) {
    %c0_i32 = arith.constant 0 : i32
    %c0_i32_0 = arith.constant 0 : i32
    %c0_i32_1 = arith.constant 0 : i32
    return %arg0, %c0_i32, %c0_i32_0 : i32, i32, i32
  }
  func.func @transform_1(%arg0: i32, %arg1: i32) -> (i32, i32, i32) {
    %c0_i32 = arith.constant 0 : i32
    %c0_i32_0 = arith.constant 0 : i32
    %c0_i32_1 = arith.constant 0 : i32
    return %arg0, %c0_i32, %c0_i32_0 : i32, i32, i32
  }
  func.func @transform_2(%arg0: i32, %arg1: i32) -> (i32, i32) {
    %c0_i32 = arith.constant 0 : i32
    %c0_i32_0 = arith.constant 0 : i32
    %c0_i32_1 = arith.constant 0 : i32
    return %c0_i32, %c0_i32_0 : i32, i32
  }
  func.func @transform_3(%arg0: i32, %arg1: i32) -> (i32, i32, i32) {
    %c0_i32 = arith.constant 0 : i32
    %c0_i32_0 = arith.constant 0 : i32
    %c0_i32_1 = arith.constant 0 : i32
    return %arg0, %c0_i32, %c0_i32_0 : i32, i32, i32
  }
}

</mosaic_0001>

<bundles_post_ra>
// kernel: tpu_custom_call.1
= control target key start
LH: loop header
LB: loop body
LE: loop exit
PB: predicated region body
PF: predicated region fallthrough
CT: control target
= control target key end

     0   :  { %s3562_s0 = inlined_call_operand.hbm [shape: f32[2,48,128], index: 0, kind: input, shape index: {}]   ;;  %s3563_s1 = inlined_call_operand.hbm [shape: f32[2,48,128], index: 1, kind: input, shape index: {}]   ;;  %s3564_s2 = inlined_call_operand.hbm [shape: f32[512,768], index: 2, kind: input, shape index: {}]   ;;  %s3565_s3 = inlined_call_operand.hbm [shape: f32[2,8,128], index: 3, kind: output, shape index: {}]  }
   0x1   :  { %3572 = sst [smem:[#allocation32_spill]] %s3562_s0 }
   0x2   :  { %3573 = sst [smem:[#allocation33_spill]] %s3564_s2 }
   0x3   :  { %8 = vsyncpa [#allocation5], 0 }
   0x4   :  { %10 = vsyncpa [#allocation5 + $0x1], 0 }
   0x5   :  { %11 = vsyncpa [#allocation8], 0 }
   0x6   :  { %13 = vsyncpa [#allocation8 + $0x1], 0 }
   0x7   :  { %14 = vsyncpa [#allocation6], 0 }
   0x8   :  { %16 = vsyncpa [#allocation6 + $0x1], 0  ;;  %s2568_s12 = smov 0   ;;  %s2570_s13 = smov 0  }
   0x9   :  { %s2572_s14 = smov 0   ;;  %s2574_s15 = smov 0  }
   0xa   :  { %s2576_s16 = smov 0   ;;  %s2578_s17 = smov 0  }
   0xb LB: > { %3574 = sst [smem:[#allocation15_spill]] %s2525_s14  ;;  %s2599_s18 = sadd.s32 4294967295, %s2537_s17   ;;  %s2537_s17 = sphi %s2578_s17, %s22_s17   ;;  %s2533_s16 = sphi %s2576_s16, %s3623_s16   ;;  %s2529_s15 = sphi %s2574_s15, %s3622_s15   ;;  %s2525_s14 = sphi %s2572_s14, %s3618_s14   ;;  %s2521_s13 = sphi %s2570_s13, %s3621_s13   ;;  %s2517_s12 = sphi %s2568_s12, %s3620_s12  }
   0xc   : > { %s2188_s19 = sadd.s32 4294967294, %s2537_s17   ;;  %p54_p0 = scmp.ne.s32.totalorder %s2521_s13, %s2517_s12 }
   0xd   : > { %p55_p1 = scmp.eq.s32.totalorder %s2599_s18, 0  ;;  %p131_p3 = scmp.eq.s32.totalorder %s2188_s19, 1 }
   0xe   : > { %p2189_p5 = scmp.ge.s32.totalorder %s2537_s17, 1  ;;  %p138_p7 = scmp.lt.s32.totalorder %s2537_s17, 3 }
   0xf   : > { %p2608_p4 = por %p55_p1, %p54_p0  ;;  %p2613_p6 = por %p131_p3, %p54_p0 }
  0x10   : > { %p2618_p8 = pnand %p2189_p5, %p138_p7  ;;  %s2539_s23 = smov [#allocation9]  }
  0x11   : > { %s3576_s21 = scalar_select %p2613_p6, 1, 0 }
  0x12   : > { %s150_s24 = sshll.u32 %s2539_s23, 4  ;;  %p2224_p9 = pneg %p2618_p8  ;;  %s151_s24 = int_to_ptr.vmem [resolvable:$true] %s150_s24 }
  0x13   : > { %p2191_p10 = scmp.ge.s32.totalorder %s2537_s17, 2  ;;  %s34_s26 = sadd.s32 1, %s2533_s16 }
  0x14   : > { %p2627_p11 = pnand %p2224_p9, %p55_p1  ;;  %s2378_s27 = scalar_lea.vmem %s151_s24, 49152 }
  0x15   : > { %p2379_p13 = scmp.ne.s32.totalorder %s151_s24, %s2378_s27  ;;  %p2386_p5 = scmp.lt.s32.totalorder %s151_s24, %s151_s24 }
  0x16   : > { %p2369_p12 = pneg %p2627_p11  ;;  %p2387_p7 = scmp.lt.s32.totalorder %s2378_s27, %s2378_s27 }
  0x18   : > { %p2381_p0 = pnand %p2379_p13, %p2369_p12  ;;  %p2388_p2 = por %p2387_p7, %p2386_p5 }
  0x1a   : > { %p2382_p3 = pneg %p2381_p0 }
  0x1c   : > { %p2389_p6 = pnand %p2388_p2, %p2382_p3 }
  0x1e   : > { %2392 = shalt.err (!%p2389_p6)
}
  0x1f   : > { %s2540_s28 = smov 768   ;;  %s2541_s29 = smov 48  }
  0x20   : > { %s3579_s2 = sld [smem:[#allocation33_spill]]  ;;  %p36_p2 = scmp.ge.s32.totalorder %s34_s26, 2 }
  0x21   : > { %s41_s5 = sadd.s32 1, %s2525_s14  ;;  %p48_p6 = scmp.ne.s32.totalorder %s2525_s14, %s2521_s13 }
  0x22   : > { %p49_p9 = scmp.eq.s32.totalorder %s2537_s17, 0  ;;  %s3625_s26 = smov (%p36_p2, %s34_s26), 0 }
  0x23   : > { %3580 = sst [smem:[#allocation16_spill]] %s3625_s26  ;;  %p3581_p13 = scmp.eq.s32.totalorder %s2599_s18, 1 }
  0x24   : > { %p50_p12 = por %p49_p9, %p48_p6  ;;  %s38_s7 = ssub.s32 %s2533_s16, %s3625_s26 }
  0x25   : > { %p2647_p0 = por %p3581_p13, %p48_p6  ;;  %p2240_p3 = scmp.lt.s32.totalorder %s2537_s17, 2 }
  0x26   : > { %2227 = dma.hbm_to_vmem [thread:$0]  (!%p2627_p11), %s3579_s2, 49152, %s151_s24, [#allocation8], %s2540_s28, %s2540_s28, %s2541_s29  }
  0x27   : > { %p39_p5 = scmp.eq.s32.totalorder %s38_s7, 0  ;;  %s164_s8 = sand.u32 1, %s2525_s14  }
  0x28   : > { %s2655_s9 = smul.u32 48, %s164_s8  ;;  %p2662_p11 = pnand %p2240_p3, %p50_p12 }
  0x29   : > { %s2658_s10 = scalar_select %p39_p5, %s2525_s14, %s41_s5  }
  0x2a   : > { %s2204_s11 = smul.u32 768, %s2533_s16  ;;  %s168_s19 = scalar_lea.vmem [#allocation4], %s2655_s9 }
  0x2b   : > { %3583 = sst [smem:[#allocation17_spill]] %s2658_s10  ;;  %s175_s23 = sshll.u32 %s168_s19, 4  ;;  %s176_s23 = int_to_ptr.vmem [resolvable:$true] %s175_s23 }
  0x2c   : > { %s3585_s0 = sld [smem:[#allocation32_spill]]  ;;  %s185_s29 = sand.u32 1, %s2537_s17  }
  0x2d   : > { %s165_s30 = scalar_lea.sflag [#allocation5], %s164_s8  ;;  %p2395_p7 = pneg %p2662_p11 }
  0x2e   : > { %s2406_s4 = scalar_lea.vmem %s176_s23, 768  ;;  %s2542_s5 = smov [#allocation4]  }
  0x2f   : > { %p2407_p2 = scmp.ne.s32.totalorder %s176_s23, %s2406_s4  ;;  %s2411_s7 = sshll.u32 %s2542_s5, 4  ;;  %s2412_s7 = int_to_ptr.vmem [resolvable:$false] %s2411_s7 }
  0x30   : > { %s2413_s19 = scalar_lea.vmem %s2412_s7, 1536  ;;  %p2414_p12 = scmp.lt.s32.totalorder %s176_s23, %s2412_s7 }
  0x31   : > { %p2409_p6 = pnand %p2407_p2, %p2395_p7  ;;  %p2415_p13 = scmp.lt.s32.totalorder %s2413_s19, %s2406_s4 }
  0x32   : > { %s174_s28 = scalar_lea.hbm %s3585_s0, %s2204_s11 }
  0x33   : > { %p2410_p9 = pneg %p2409_p6  ;;  %p2416_p3 = por %p2415_p13, %p2414_p12 }
  0x35   : > { %p2417_p5 = pnand %p2416_p3, %p2410_p9 }
  0x37   : > { %2420 = shalt.err (!%p2417_p5)
}
  0x38   : > { %s2543_s25 = smov 128   ;;  %s2544_s8 = smov 8  }
  0x39   : > { %2231 = dma.hbm_to_vmem [thread:$0]  (!%p2662_p11), %s174_s28, 768, %s176_s23, %s165_s30, %s2543_s25, %s2543_s25, %s2544_s8  }
  0x3a   : > { %s195_s5 = scalar_lea.hbm %s3563_s1, %s2204_s11  ;;  %s189_s2 = scalar_lea.vmem [#allocation7], %s2655_s9 }
  0x3b   : > { %s196_s26 = sshll.u32 %s189_s2, 4  ;;  %s186_s4 = scalar_lea.sflag [#allocation8], %s185_s29  ;;  %s197_s26 = int_to_ptr.vmem [resolvable:$true] %s196_s26 }
  0x3c   : > { %s2434_s7 = scalar_lea.vmem %s197_s26, 768  ;;  %s2545_s19 = smov [#allocation7]  }
  0x3d   : > { %p2435_p2 = scmp.ne.s32.totalorder %s197_s26, %s2434_s7  ;;  %s2439_s10 = sshll.u32 %s2545_s19, 4  ;;  %s2440_s10 = int_to_ptr.vmem [resolvable:$false] %s2439_s10 }
  0x3e   : > { %s2441_s14 = scalar_lea.vmem %s2440_s10, 1536  ;;  %p2442_p12 = scmp.lt.s32.totalorder %s197_s26, %s2440_s10 }
  0x3f   : > { %p2437_p6 = pnand %p2435_p2, %p2395_p7  ;;  %p2443_p13 = scmp.lt.s32.totalorder %s2441_s14, %s2434_s7 }
  0x41   : > { %p2438_p9 = pneg %p2437_p6  ;;  %p2444_p3 = por %p2443_p13, %p2442_p12 }
  0x43   : > { %p2445_p5 = pnand %p2444_p3, %p2438_p9 }
  0x45   : > { %2448 = shalt.err (!%p2445_p5)
}
  0x46   : > { %2234 = dma.hbm_to_vmem [thread:$0]  (!%p2662_p11), %s195_s5, 768, %s197_s26, %s186_s4, %s2543_s25, %s2543_s25, %s2544_s8  }
  0x47   : > { %208 = sbr.rel (%p2618_p8) target bundleno = 826 (0x33a), region = 32 }
  0x4c   : > { %s2693_s0 = sand.u32 1, %s2521_s13  }
  0x4d   : > { %s2207_s2 = smul.u32 48, %s2693_s0  ;;  %s211_s9 = scalar_lea.sflag [#allocation5], %s2693_s0 }
  0x4f   : > { %s2697_s11 = scalar_lea.vmem [#allocation4], %s2207_s2 }
  0x50   : > { %2500 = dma.done.wait (%p2608_p4), %s211_s9, 768  }
  0x51   : > { %2502 = vsyncadd (%p2608_p4), %s211_s9, 4294966528  ;;  %s219_s14 = sand.u32 1, %s2599_s18   ;;  %s2704_s26 = scalar_lea.vmem [#allocation7], %s2207_s2 }
  0x52   : > { %s220_s22 = scalar_lea.sflag [#allocation8], %s219_s14 }
  0x53   : > { %2504 = dma.done.wait (%p2608_p4), %s220_s22, 768  }
  0x54   : > { %2506 = vsyncadd (%p2608_p4), %s220_s22, 4294966528 }
  0x55   : > { %2508 = dma.done.wait (%p55_p1), [#allocation8], 49152  }
  0x56   : > { %2510 = vsyncadd (%p55_p1), [#allocation8], 4294918144  ;;  %v557_v0 = vld [vmem:[#allocation9 + $0x2d8] sm:$0xff]  ;;  %v556_v2 = vld [vmem:[#allocation9 + $0x2d0] sm:$0xff]  ;;  %vm291_vm0 = vcmask 1046528   ;;  %vm383_vm1 = vcmask 1044480  }
  0x57   : > { %v749_v1 = vld [vmem:[#allocation9 + $0x8d8] sm:$0xff]  ;;  %850 = vmatprep.subr.mxu0 %v557_v0  ;;  %v748_v3 = vld [vmem:[#allocation9 + $0x8d0] sm:$0xff]  ;;  %v551_v4 = vld [vmem:[#allocation9 + $0x2a8] sm:$0xff]  ;;  %vm340_vm2 = vcmask 1045504   ;;  %s2196_s10 = sshll.u32 %s2693_s0, 3  ;;  %s2200_s28 = sshll.u32 %s2529_s15, 7 }
  0x58   : > { %975 = vmatprep.subr.mxu1 %v749_v1  ;;  %v743_v5 = vld [vmem:[#allocation9 + $0x8a8] sm:$0xff]  ;;  %851 = vmatpush1.msra.mxu0 %v556_v2  ;;  %v550_v6 = vld [vmem:[#allocation9 + $0x2a0] sm:$0xff]  ;;  %v545_v8 = vld [vmem:[#allocation9 + $0x278] sm:$0xff]  ;;  %s254_s29 = scalar_lea.vmem [#allocation10], %s2196_s10  ;;  %s2071_s27 = scalar_lea.hbm %s3565_s3, %s2200_s28 }
  0x59   : > { %976 = vmatpush1.msra.mxu1 %v748_v3  ;;  %v742_v7 = vld [vmem:[#allocation9 + $0x8a0] sm:$0xff]  ;;  %852 = vmatprep.subr.mxu0 %v551_v4  ;;  %v737_v9 = vld [vmem:[#allocation9 + $0x878] sm:$0xff]  ;;  %v544_v10 = vld [vmem:[#allocation9 + $0x270] sm:$0xff]  ;;  %s2073_s30 = sshll.u32 %s254_s29, 4  ;;  %s2060_s5 = scalar_lea.sflag [#allocation6], %s2693_s0  ;;  %s2074_s30 = int_to_ptr.vmem [resolvable:$true] %s2073_s30 }
  0x5a   : > { %977 = vmatprep.subr.mxu1 %v743_v5  ;;  %v736_v11 = vld [vmem:[#allocation9 + $0x870] sm:$0xff]  ;;  %853 = vmatpush1.msra.mxu0 %v550_v6  ;;  %v539_v12 = vld [vmem:[#allocation9 + $0x248] sm:$0xff]  ;;  %v538_v14 = vld [vmem:[#allocation9 + $0x240] sm:$0xff]  ;;  %s2449_s4 = scalar_lea.vmem %s2074_s30, 128  ;;  %s2547_s7 = smov [#allocation10]  }
  0x5b   : > { %978 = vmatpush1.msra.mxu1 %v742_v7  ;;  %v731_v13 = vld [vmem:[#allocation9 + $0x848] sm:$0xff]  ;;  %854 = vmatprep.subr.mxu0 %v545_v8  ;;  %v730_v15 = vld [vmem:[#allocation9 + $0x840] sm:$0xff]  ;;  %v533_v16 = vld [vmem:[#allocation9 + $0x218] sm:$0xff]  ;;  %p2450_p1 = scmp.ne.s32.totalorder %s2074_s30, %s2449_s4  ;;  %s2453_s15 = sshll.u32 %s2547_s7, 4  ;;  %s2454_s15 = int_to_ptr.vmem [resolvable:$false] %s2453_s15 }
  0x5c   : > { %979 = vmatprep.subr.mxu1 %v737_v9  ;;  %855 = vmatpush1.msra.mxu0 %v544_v10  ;;  %v725_v17 = vld [vmem:[#allocation9 + $0x818] sm:$0xff]  ;;  %v532_v18 = vld [vmem:[#allocation9 + $0x210] sm:$0xff]  ;;  %v527_v20 = vld [vmem:[#allocation9 + $0x1e8] sm:$0xff]  ;;  %s2455_s19 = scalar_lea.vmem %s2454_s15, 256  ;;  %p2456_p11 = scmp.lt.s32.totalorder %s2074_s30, %s2454_s15 }
  0x5d   : > { %980 = vmatpush1.msra.mxu1 %v736_v11  ;;  %856 = vmatprep.subr.mxu0 %v539_v12  ;;  %v724_v19 = vld [vmem:[#allocation9 + $0x810] sm:$0xff]  ;;  %v719_v21 = vld [vmem:[#allocation9 + $0x7e8] sm:$0xff]  ;;  %v526_v22 = vld [vmem:[#allocation9 + $0x1e0] sm:$0xff]  ;;  %p2451_p4 = pnand %p2450_p1, %p2647_p0  ;;  %p2457_p7 = scmp.lt.s32.totalorder %s2455_s19, %s2449_s4 }
  0x5e   : > { %981 = vmatprep.subr.mxu1 %v731_v13  ;;  %857 = vmatpush1.msra.mxu0 %v538_v14  ;;  %v718_v23 = vld [vmem:[#allocation9 + $0x7e0] sm:$0xff]  ;;  %v521_v24 = vld [vmem:[#allocation9 + $0x1b8] sm:$0xff]  ;;  %v520_v26 = vld [vmem:[#allocation9 + $0x1b0] sm:$0xff] }
  0x5f   : > { %982 = vmatpush1.msra.mxu1 %v730_v15  ;;  %858 = vmatprep.subr.mxu0 %v533_v16  ;;  %v713_v25 = vld [vmem:[#allocation9 + $0x7b8] sm:$0xff]  ;;  %v712_v27 = vld [vmem:[#allocation9 + $0x7b0] sm:$0xff]  ;;  %v515_v28 = vld [vmem:[#allocation9 + $0x188] sm:$0xff]  ;;  %p2452_p8 = pneg %p2451_p4  ;;  %p2458_p2 = por %p2457_p7, %p2456_p11 }
  0x60   : > { %983 = vmatprep.subr.mxu1 %v725_v17  ;;  %859 = vmatpush1.msra.mxu0 %v532_v18  ;;  %v707_v29 = vld [vmem:[#allocation9 + $0x788] sm:$0xff]  ;;  %v514_v30 = vld [vmem:[#allocation9 + $0x180] sm:$0xff]  ;;  %v509_v32 = vld [vmem:[#allocation9 + $0x158] sm:$0xff] }
  0x61   : > { %984 = vmatpush1.msra.mxu1 %v724_v19  ;;  %860 = vmatprep.subr.mxu0 %v527_v20  ;;  %v706_v31 = vld [vmem:[#allocation9 + $0x780] sm:$0xff]  ;;  %v701_v33 = vld [vmem:[#allocation9 + $0x758] sm:$0xff]  ;;  %v508_v34 = vld [vmem:[#allocation9 + $0x150] sm:$0xff]  ;;  %p2459_p6 = pnand %p2458_p2, %p2452_p8 }
  0x62   : > { %985 = vmatprep.subr.mxu1 %v719_v21  ;;  %861 = vmatpush1.msra.mxu0 %v526_v22  ;;  %v700_v35 = vld [vmem:[#allocation9 + $0x750] sm:$0xff]  ;;  %v503_v36 = vld [vmem:[#allocation9 + $0x128] sm:$0xff]  ;;  %v502_v38 = vld [vmem:[#allocation9 + $0x120] sm:$0xff] }
  0x63   : > { %986 = vmatpush1.msra.mxu1 %v718_v23  ;;  %862 = vmatprep.subr.mxu0 %v521_v24  ;;  %v695_v37 = vld [vmem:[#allocation9 + $0x728] sm:$0xff]  ;;  %v694_v39 = vld [vmem:[#allocation9 + $0x720] sm:$0xff]  ;;  %v497_v40 = vld [vmem:[#allocation9 + $0xf8] sm:$0xff] }
  0x64   : > { %987 = vmatprep.subr.mxu1 %v713_v25  ;;  %863 = vmatpush1.msra.mxu0 %v520_v26  ;;  %v689_v41 = vld [vmem:[#allocation9 + $0x6f8] sm:$0xff]  ;;  %v496_v42 = vld [vmem:[#allocation9 + $0xf0] sm:$0xff]  ;;  %v491_v44 = vld [vmem:[#allocation9 + $0xc8] sm:$0xff] }
  0x65   : > { %988 = vmatpush1.msra.mxu1 %v712_v27  ;;  %864 = vmatprep.subr.mxu0 %v515_v28  ;;  %v688_v43 = vld [vmem:[#allocation9 + $0x6f0] sm:$0xff]  ;;  %v683_v45 = vld [vmem:[#allocation9 + $0x6c8] sm:$0xff]  ;;  %v490_v46 = vld [vmem:[#allocation9 + $0xc0] sm:$0xff] }
  0x66   : > { %989 = vmatprep.subr.mxu1 %v707_v29  ;;  %865 = vmatpush1.msra.mxu0 %v514_v30  ;;  %v682_v47 = vld [vmem:[#allocation9 + $0x6c0] sm:$0xff]  ;;  %v485_v48 = vld [vmem:[#allocation9 + $0x98] sm:$0xff]  ;;  %v484_v50 = vld [vmem:[#allocation9 + $0x90] sm:$0xff] }
  0x67   : > { %990 = vmatpush1.msra.mxu1 %v706_v31  ;;  %866 = vmatprep.subr.mxu0 %v509_v32  ;;  %v677_v49 = vld [vmem:[#allocation9 + $0x698] sm:$0xff]  ;;  %v676_v51 = vld [vmem:[#allocation9 + $0x690] sm:$0xff]  ;;  %v479_v52 = vld [vmem:[#allocation9 + $0x68] sm:$0xff] }
  0x68   : > { %991 = vmatprep.subr.mxu1 %v701_v33  ;;  %867 = vmatpush1.msra.mxu0 %v508_v34  ;;  %v671_v53 = vld [vmem:[#allocation9 + $0x668] sm:$0xff]  ;;  %v478_v54 = vld [vmem:[#allocation9 + $0x60] sm:$0xff]  ;;  %v473_v56 = vld [vmem:[#allocation9 + $0x38] sm:$0xff] }
  0x69   : > { %992 = vmatpush1.msra.mxu1 %v700_v35  ;;  %868 = vmatprep.subr.mxu0 %v503_v36  ;;  %v670_v55 = vld [vmem:[#allocation9 + $0x660] sm:$0xff]  ;;  %v665_v57 = vld [vmem:[#allocation9 + $0x638] sm:$0xff]  ;;  %v472_v58 = vld [vmem:[#allocation9 + $0x30] sm:$0xff] }
  0x6a   : > { %993 = vmatprep.subr.mxu1 %v695_v37  ;;  %869 = vmatpush1.msra.mxu0 %v502_v38  ;;  %v664_v59 = vld [vmem:[#allocation9 + $0x630] sm:$0xff]  ;;  %v467_v60 = vld [vmem:[#allocation9 + $0x8] sm:$0xff]  ;;  %v466_v62 = vld [vmem:[#allocation9] sm:$0xff] }
  0x6b   : > { %994 = vmatpush1.msra.mxu1 %v694_v39  ;;  %870 = vmatprep.subr.mxu0 %v497_v40  ;;  %v659_v61 = vld [vmem:[#allocation9 + $0x608] sm:$0xff]  ;;  %v658_v63 = vld [vmem:[#allocation9 + $0x600] sm:$0xff]  ;;  %v653_v0 = vld [vmem:[#allocation9 + $0x5d8] sm:$0xff] }
  0x6c   : > { %995 = vmatprep.subr.mxu1 %v689_v41  ;;  %871 = vmatpush1.msra.mxu0 %v496_v42  ;;  %v845_v1 = vld [vmem:[#allocation9 + $0xbd8] sm:$0xff]  ;;  %v652_v2 = vld [vmem:[#allocation9 + $0x5d0] sm:$0xff]  ;;  %v647_v4 = vld [vmem:[#allocation9 + $0x5a8] sm:$0xff] }
  0x6d   : > { %996 = vmatpush1.msra.mxu1 %v688_v43  ;;  %872 = vmatprep.subr.mxu0 %v491_v44  ;;  %v844_v3 = vld [vmem:[#allocation9 + $0xbd0] sm:$0xff]  ;;  %v839_v5 = vld [vmem:[#allocation9 + $0xba8] sm:$0xff]  ;;  %v646_v6 = vld [vmem:[#allocation9 + $0x5a0] sm:$0xff] }
  0x6e   : > { %997 = vmatprep.subr.mxu1 %v683_v45  ;;  %873 = vmatpush1.msra.mxu0 %v490_v46  ;;  %v838_v7 = vld [vmem:[#allocation9 + $0xba0] sm:$0xff]  ;;  %v641_v8 = vld [vmem:[#allocation9 + $0x578] sm:$0xff]  ;;  %v640_v10 = vld [vmem:[#allocation9 + $0x570] sm:$0xff] }
  0x6f   : > { %998 = vmatpush1.msra.mxu1 %v682_v47  ;;  %874 = vmatprep.subr.mxu0 %v485_v48  ;;  %v833_v9 = vld [vmem:[#allocation9 + $0xb78] sm:$0xff]  ;;  %v832_v11 = vld [vmem:[#allocation9 + $0xb70] sm:$0xff]  ;;  %v635_v12 = vld [vmem:[#allocation9 + $0x548] sm:$0xff] }
  0x70   : > { %999 = vmatprep.subr.mxu1 %v677_v49  ;;  %875 = vmatpush1.msra.mxu0 %v484_v50  ;;  %v827_v13 = vld [vmem:[#allocation9 + $0xb48] sm:$0xff]  ;;  %v634_v14 = vld [vmem:[#allocation9 + $0x540] sm:$0xff]  ;;  %v629_v16 = vld [vmem:[#allocation9 + $0x518] sm:$0xff] }
  0x71   : > { %1000 = vmatpush1.msra.mxu1 %v676_v51  ;;  %876 = vmatprep.subr.mxu0 %v479_v52  ;;  %v826_v15 = vld [vmem:[#allocation9 + $0xb40] sm:$0xff]  ;;  %v821_v17 = vld [vmem:[#allocation9 + $0xb18] sm:$0xff]  ;;  %v628_v18 = vld [vmem:[#allocation9 + $0x510] sm:$0xff] }
  0x72   : > { %1001 = vmatprep.subr.mxu1 %v671_v53  ;;  %877 = vmatpush1.msra.mxu0 %v478_v54  ;;  %v820_v19 = vld [vmem:[#allocation9 + $0xb10] sm:$0xff]  ;;  %v623_v20 = vld [vmem:[#allocation9 + $0x4e8] sm:$0xff]  ;;  %v622_v22 = vld [vmem:[#allocation9 + $0x4e0] sm:$0xff] }
  0x73   : > { %1002 = vmatpush1.msra.mxu1 %v670_v55  ;;  %878 = vmatprep.subr.mxu0 %v473_v56  ;;  %v815_v21 = vld [vmem:[#allocation9 + $0xae8] sm:$0xff]  ;;  %v814_v23 = vld [vmem:[#allocation9 + $0xae0] sm:$0xff]  ;;  %v617_v24 = vld [vmem:[#allocation9 + $0x4b8] sm:$0xff] }
  0x74   : > { %1003 = vmatprep.subr.mxu1 %v665_v57  ;;  %879 = vmatpush1.msra.mxu0 %v472_v58  ;;  %v809_v25 = vld [vmem:[#allocation9 + $0xab8] sm:$0xff]  ;;  %v616_v26 = vld [vmem:[#allocation9 + $0x4b0] sm:$0xff]  ;;  %v611_v28 = vld [vmem:[#allocation9 + $0x488] sm:$0xff] }
  0x75   : > { %1004 = vmatpush1.msra.mxu1 %v664_v59  ;;  %880 = vmatprep.subr.mxu0 %v467_v60  ;;  %v808_v27 = vld [vmem:[#allocation9 + $0xab0] sm:$0xff]  ;;  %v803_v29 = vld [vmem:[#allocation9 + $0xa88] sm:$0xff]  ;;  %v610_v30 = vld [vmem:[#allocation9 + $0x480] sm:$0xff] }
  0x76   : > { %1005 = vmatprep.subr.mxu1 %v659_v61  ;;  %881 = vmatpush1.msra.mxu0 %v466_v62  ;;  %v802_v31 = vld [vmem:[#allocation9 + $0xa80] sm:$0xff]  ;;  %v605_v32 = vld [vmem:[#allocation9 + $0x458] sm:$0xff]  ;;  %v604_v34 = vld [vmem:[#allocation9 + $0x450] sm:$0xff] }
  0x77   : > { %1006 = vmatpush1.msra.mxu1 %v658_v63  ;;  %882 = vmatprep.subr.mxu0 %v653_v0  ;;  %v797_v33 = vld [vmem:[#allocation9 + $0xa58] sm:$0xff]  ;;  %v796_v35 = vld [vmem:[#allocation9 + $0xa50] sm:$0xff]  ;;  %v599_v36 = vld [vmem:[#allocation9 + $0x428] sm:$0xff] }
  0x78   : > { %1007 = vmatprep.subr.mxu1 %v845_v1  ;;  %883 = vmatpush2.msra.mxu0 %v652_v2  ;;  %v791_v37 = vld [vmem:[#allocation9 + $0xa28] sm:$0xff]  ;;  %v598_v38 = vld [vmem:[#allocation9 + $0x420] sm:$0xff]  ;;  %v593_v40 = vld [vmem:[#allocation9 + $0x3f8] sm:$0xff] }
  0x79   : > { %1008 = vmatpush2.msra.mxu1 %v844_v3  ;;  %884 = vmatprep.subr.mxu0 %v647_v4  ;;  %v790_v39 = vld [vmem:[#allocation9 + $0xa20] sm:$0xff]  ;;  %v785_v41 = vld [vmem:[#allocation9 + $0x9f8] sm:$0xff]  ;;  %v592_v42 = vld [vmem:[#allocation9 + $0x3f0] sm:$0xff] }
  0x7a   : > { %1009 = vmatprep.subr.mxu1 %v839_v5  ;;  %885 = vmatpush2.msra.mxu0 %v646_v6  ;;  %v784_v43 = vld [vmem:[#allocation9 + $0x9f0] sm:$0xff]  ;;  %v587_v44 = vld [vmem:[#allocation9 + $0x3c8] sm:$0xff]  ;;  %v586_v46 = vld [vmem:[#allocation9 + $0x3c0] sm:$0xff] }
  0x7b   : > { %1010 = vmatpush2.msra.mxu1 %v838_v7  ;;  %886 = vmatprep.subr.mxu0 %v641_v8  ;;  %v779_v45 = vld [vmem:[#allocation9 + $0x9c8] sm:$0xff]  ;;  %v778_v47 = vld [vmem:[#allocation9 + $0x9c0] sm:$0xff]  ;;  %v581_v48 = vld [vmem:[#allocation9 + $0x398] sm:$0xff] }
  0x7c   : > { %1011 = vmatprep.subr.mxu1 %v833_v9  ;;  %887 = vmatpush2.msra.mxu0 %v640_v10  ;;  %v773_v49 = vld [vmem:[#allocation9 + $0x998] sm:$0xff]  ;;  %v2715_v50 = vld [vmem:[%s2697_s11] sm:$0xff]  ;;  %v575_v54 = vld [vmem:[#allocation9 + $0x368] sm:$0xff] }
  0x7d   : > { %1012 = vmatpush2.msra.mxu1 %v832_v11  ;;  %888 = vmatprep.subr.mxu0 %v635_v12  ;;  %v2718_v51 = vld [vmem:[%s2697_s11 + $0x8] sm:$0xff]  ;;  %v580_v52 = vld [vmem:[#allocation9 + $0x390] sm:$0xff]  ;;  %v574_v56 = vld [vmem:[#allocation9 + $0x360] sm:$0xff]  ;;  %v292_v58 = vrot.slane %v2715_v50, 1  ;;  %v384_v62 = vrot.slane %v2715_v50, 3  ;;  %v341_v2 = vrot.slane %v2715_v50, 2 }
  0x7e   : > { %1013 = vmatprep.subr.mxu1 %v827_v13  ;;  %889 = vmatpush2.msra.mxu0 %v634_v14  ;;  %v772_v53 = vld [vmem:[#allocation9 + $0x990] sm:$0xff]  ;;  %v767_v55 = vld [vmem:[#allocation9 + $0x968] sm:$0xff]  ;;  %v766_v57 = vld [vmem:[#allocation9 + $0x960] sm:$0xff]  ;;  %v293_v59 = vrot.slane %v2718_v51, 1  ;;  %v385_v63 = vrot.slane %v2718_v51, 3  ;;  %v342_v3 = vrot.slane %v2718_v51, 2 }
  0x7f   : > { %1014 = vmatpush2.msra.mxu1 %v826_v15  ;;  %890 = vmatprep.subr.mxu0 %v629_v16  ;;  %v569_v60 = vld [vmem:[#allocation9 + $0x338] sm:$0xff]  ;;  %v568_v0 = vld [vmem:[#allocation9 + $0x330] sm:$0xff]  ;;  %v563_v4 = vld [vmem:[#allocation9 + $0x308] sm:$0xff] }
  0x80   : > { %1015 = vmatprep.subr.mxu1 %v821_v17  ;;  %891 = vmatpush2.msra.mxu0 %v628_v18  ;;  %v761_v61 = vld [vmem:[#allocation9 + $0x938] sm:$0xff]  ;;  %v760_v1 = vld [vmem:[#allocation9 + $0x930] sm:$0xff]  ;;  %v755_v5 = vld [vmem:[#allocation9 + $0x908] sm:$0xff]  ;;  %v2730_v8 = vsel %vm291_vm0, %v292_v58, %v293_v59  ;;  %v2733_v10 = vsel %vm383_vm1, %v384_v62, %v385_v63  ;;  %v2736_v11 = vsel %vm340_vm2, %v341_v2, %v342_v3 }
  0x81   : > { %1016 = vmatpush2.msra.mxu1 %v820_v19  ;;  %892 = vmatprep.subr.mxu0 %v623_v20  ;;  %v2727_v6 = vld [vmem:[%s2697_s11 + $0x10] sm:$0xff]  ;;  %v559_v14 = vld [vmem:[#allocation9 + $0x2e8] sm:$0xff]  ;;  %v553_v19 = vld [vmem:[#allocation9 + $0x2b8] sm:$0xff] }
  0x82   : > { %1017 = vmatprep.subr.mxu1 %v815_v21  ;;  %893 = vmatpush2.msra.mxu0 %v622_v22  ;;  %v562_v7 = vld [vmem:[#allocation9 + $0x300] sm:$0xff]  ;;  %v295_v12 = vrot.slane %v2727_v6, 1  ;;  %v387_v13 = vrot.slane %v2727_v6, 3  ;;  %v751_v15 = vld [vmem:[#allocation9 + $0x8e8] sm:$0xff]  ;;  %v344_v18 = vrot.slane %v2727_v6, 2  ;;  %v745_v20 = vld [vmem:[#allocation9 + $0x8b8] sm:$0xff] }
  0x83   : > { %1018 = vmatpush2.msra.mxu1 %v814_v23  ;;  %894 = vmatprep.subr.mxu0 %v617_v24  ;;  %v754_v9 = vld [vmem:[#allocation9 + $0x900] sm:$0xff]  ;;  %v2746_v21 = vld [vmem:[%s2697_s11 + $0x18] sm:$0xff]  ;;  %v552_v24 = vld [vmem:[#allocation9 + $0x2b0] sm:$0xff] }
  0x84   : > { %1019 = vmatprep.subr.mxu1 %v809_v25  ;;  %895 = vmatpush2.msra.mxu0 %v616_v26  ;;  %v558_v16 = vld [vmem:[#allocation9 + $0x2e0] sm:$0xff]  ;;  %v2749_v22 = vsel %vm291_vm0, %v293_v59, %v295_v12  ;;  %v2752_v23 = vsel %vm383_vm1, %v385_v63, %v387_v13  ;;  %v744_v25 = vld [vmem:[#allocation9 + $0x8b0] sm:$0xff]  ;;  %v2755_v26 = vsel %vm340_vm2, %v342_v3, %v344_v18  ;;  %v715_v62 = vld [vmem:[#allocation9 + $0x7c8] sm:$0xff] }
  0x85   : > { %1020 = vmatpush2.msra.mxu1 %v808_v27  ;;  %896 = vmatprep.subr.mxu0 %v611_v28  ;;  %v750_v17 = vld [vmem:[#allocation9 + $0x8e0] sm:$0xff]  ;;  %v297_v27 = vrot.slane %v2746_v21, 1  ;;  %v389_v28 = vrot.slane %v2746_v21, 3  ;;  %v517_v2 = vld [vmem:[#allocation9 + $0x198] sm:$0xff] }
  0x86   : > { %1021 = vmatprep.subr.mxu1 %v803_v29  ;;  %897 = vmatpush2.msra.mxu0 %v610_v30  ;;  %v547_v29 = vld [vmem:[#allocation9 + $0x288] sm:$0xff]  ;;  %v709_v3 = vld [vmem:[#allocation9 + $0x798] sm:$0xff] }
  0x87   : > { %1022 = vmatpush2.msra.mxu1 %v802_v31  ;;  %898 = vmatprep.subr.mxu0 %v605_v32  ;;  %v739_v30 = vld [vmem:[#allocation9 + $0x888] sm:$0xff]  ;;  %v546_v31 = vld [vmem:[#allocation9 + $0x280] sm:$0xff] }
  0x88   : > { %1023 = vmatprep.subr.mxu1 %v797_v33  ;;  %899 = vmatpush2.msra.mxu0 %v604_v34  ;;  %v738_v32 = vld [vmem:[#allocation9 + $0x880] sm:$0xff]  ;;  %v346_v33 = vrot.slane %v2746_v21, 2  ;;  %v541_v34 = vld [vmem:[#allocation9 + $0x258] sm:$0xff] }
  0x89   : > { %1024 = vmatpush2.msra.mxu1 %v796_v35  ;;  %900 = vmatprep.subr.mxu0 %v599_v36  ;;  %v733_v35 = vld [vmem:[#allocation9 + $0x858] sm:$0xff]  ;;  %v2765_v36 = vld [vmem:[%s2697_s11 + $0x20] sm:$0xff] }
  0x8a   : > { %1025 = vmatprep.subr.mxu1 %v791_v37  ;;  %901 = vmatpush2.msra.mxu0 %v598_v38  ;;  %v2768_v37 = vsel %vm291_vm0, %v295_v12, %v297_v27  ;;  %v2771_v38 = vsel %vm383_vm1, %v387_v13, %v389_v28  ;;  %v516_v12 = vld [vmem:[#allocation9 + $0x190] sm:$0xff] }
  0x8b   : > { %1026 = vmatpush2.msra.mxu1 %v790_v39  ;;  %902 = vmatprep.subr.mxu0 %v593_v40  ;;  %v540_v39 = vld [vmem:[#allocation9 + $0x250] sm:$0xff] }
  0x8c   : > { %1027 = vmatprep.subr.mxu1 %v785_v41  ;;  %903 = vmatpush2.msra.mxu0 %v592_v42  ;;  %v732_v40 = vld [vmem:[#allocation9 + $0x850] sm:$0xff]  ;;  %v2774_v41 = vsel %vm340_vm2, %v344_v18, %v346_v33  ;;  %v299_v42 = vrot.slane %v2765_v36, 1 }
  0x8d   : > { %1028 = vmatpush2.msra.mxu1 %v784_v43  ;;  %904 = vmatprep.subr.mxu0 %v587_v44  ;;  %v391_v43 = vrot.slane %v2765_v36, 3  ;;  %v535_v44 = vld [vmem:[#allocation9 + $0x228] sm:$0xff]  ;;  %v708_v13 = vld [vmem:[#allocation9 + $0x790] sm:$0xff] }
  0x8e   : > { %1029 = vmatprep.subr.mxu1 %v779_v45  ;;  %905 = vmatpush2.msra.mxu0 %v586_v46  ;;  %v727_v45 = vld [vmem:[#allocation9 + $0x828] sm:$0xff]  ;;  %v534_v46 = vld [vmem:[#allocation9 + $0x220] sm:$0xff] }
  0x8f   : > { %1030 = vmatpush2.msra.mxu1 %v778_v47  ;;  %906 = vmatprep.subr.mxu0 %v581_v48  ;;  %v726_v47 = vld [vmem:[#allocation9 + $0x820] sm:$0xff]  ;;  %v348_v48 = vrot.slane %v2765_v36, 2 }
  0x90   : > { %1031 = vmatprep.subr.mxu1 %v773_v49  ;;  %907 = vmatpush2.msra.mxu0 %v580_v52  ;;  %v529_v49 = vld [vmem:[#allocation9 + $0x1f8] sm:$0xff] }
  0x91   : > { %1032 = vmatpush2.msra.mxu1 %v772_v53  ;;  %908 = vmatprep.subr.mxu0 %v575_v54  ;;  %v721_v52 = vld [vmem:[#allocation9 + $0x7f8] sm:$0xff]  ;;  %v2785_v54 = vsel %vm291_vm0, %v297_v27, %v299_v42  ;;  %v2791_v58 = vsel %vm340_vm2, %v346_v33, %v348_v48  ;;  %v504_v33 = vld [vmem:[#allocation9 + $0x130] sm:$0xff] }
  0x92   : > { %1033 = vmatprep.subr.mxu1 %v767_v55  ;;  %909 = vmatpush2.msra.mxu0 %v574_v56  ;;  %v267_v53 = vld [vmem:[%s2697_s11 + $0x28] sm:$0xff]  ;;  %v2788_v55 = vsel %vm383_vm1, %v389_v28, %v391_v43  ;;  %v528_v56 = vld [vmem:[#allocation9 + $0x1f0] sm:$0xff] }
  0x93   : > { %1034 = vmatpush2.msra.mxu1 %v766_v57  ;;  %910 = vmatprep.subr.mxu0 %v569_v60  ;;  %v720_v57 = vld [vmem:[#allocation9 + $0x7f0] sm:$0xff]  ;;  %v301_v59 = vrot.slane %v267_v53, 1  ;;  %v393_v60 = vrot.slane %v267_v53, 3  ;;  %v350_v63 = vrot.slane %v267_v53, 2  ;;  %v487_v53 = vld [vmem:[#allocation9 + $0xa8] sm:$0xff] }
  0x94   : > { %1035 = vmatprep.subr.mxu1 %v761_v61  ;;  %911 = vmatpush2.msra.mxu0 %v568_v0  ;;  %v523_v61 = vld [vmem:[#allocation9 + $0x1c8] sm:$0xff]  ;;  %v522_v0 = vld [vmem:[#allocation9 + $0x1c0] sm:$0xff] }
  0x95   : > { %1036 = vmatpush2.msra.mxu1 %v760_v1  ;;  %912 = vmatprep.subr.mxu0 %v563_v4  ;;  %v714_v1 = vld [vmem:[#allocation9 + $0x7c0] sm:$0xff] }
  0x96   : > { %1037 = vmatprep.subr.mxu1 %v755_v5  ;;  %913 = vmatpush2.msra.mxu0 %v562_v7  ;;  %v2798_v4 = vld [vmem:[%s2704_s26] sm:$0xff]  ;;  %v2801_v5 = vld [vmem:[%s2704_s26 + $0x8] sm:$0xff]  ;;  %v2804_v7 = vsel %vm291_vm0, %v299_v42, %v301_v59 }
  0x97   : > { %914 = vmatprep.mubr.f32.mxu0 %v2730_v8  ;;  %1038 = vmatpush2.msra.mxu1 %v754_v9  ;;  %v2807_v9 = vsel %vm383_vm1, %v391_v43, %v393_v60  ;;  %v406_v18 = vrot.slane %v2801_v5, 3  ;;  %v362_v27 = vrot.slane %v2798_v4, 2  ;;  %v363_v28 = vrot.slane %v2801_v5, 2  ;;  %v691_v42 = vld [vmem:[#allocation9 + $0x708] sm:$0xff]  ;;  %v498_v43 = vld [vmem:[#allocation9 + $0x100] sm:$0xff] }
  0x98   : > { %1039 = vmatprep.mubr.f32.mxu1 %v2733_v10  ;;  %915 = vmatmul.mubr.f32.vlgmr.msra.gmra.mxu0 %v2715_v50  ;;  %v486_v59 = vld [vmem:[#allocation9 + $0xa0] sm:$0xff] }
  0x99   : > { %1040 = vmatmul.mubr.f32.vlgmr.msra.gmra.mxu1 %v2736_v11  ;;  %1100 = vmatprep.subr.mxu0 %v559_v14  ;;  %v2810_v14 = vsel %vm340_vm2, %v348_v48, %v350_v63  ;;  %v678_v60 = vld [vmem:[#allocation9 + $0x6a0] sm:$0xff] }
  0x9a   : > { %1225 = vmatprep.subr.mxu1 %v751_v15  ;;  %1101 = vmatpush1.msra.mxu0 %v558_v16  ;;  %v319_v15 = vrot.slane %v2798_v4, 1  ;;  %v320_v16 = vrot.slane %v2801_v5, 1 }
  0x9b   : > { %1226 = vmatpush1.msra.mxu1 %v750_v17  ;;  %1102 = vmatprep.subr.mxu0 %v553_v19  ;;  %v405_v17 = vrot.slane %v2798_v4, 3  ;;  %v511_v19 = vld [vmem:[#allocation9 + $0x168] sm:$0xff] }
  0x9c   : > { %1227 = vmatprep.subr.mxu1 %v745_v20  ;;  %920 = vmatprep.mubr.f32.mxu0 %v2749_v22  ;;  %v703_v20 = vld [vmem:[#allocation9 + $0x768] sm:$0xff] }
  0x9d   : > { %1045 = vmatprep.mubr.f32.mxu1 %v2752_v23  ;;  %1103 = vmatpush1.msra.mxu0 %v552_v24  ;;  %v510_v24 = vld [vmem:[#allocation9 + $0x160] sm:$0xff] }
  0x9e   : > { %1228 = vmatpush1.msra.mxu1 %v744_v25  ;;  %921 = vmatmul.mubr.f32.gmra.mxu0 %v2718_v51  ;;  %v702_v25 = vld [vmem:[#allocation9 + $0x760] sm:$0xff] }
  0x9f   : > { %1046 = vmatmul.mubr.f32.gmra.mxu1 %v2755_v26  ;;  %1104 = vmatprep.subr.mxu0 %v547_v29  ;;  %v505_v29 = vld [vmem:[#allocation9 + $0x138] sm:$0xff] }
  0xa0   : > { %1229 = vmatprep.subr.mxu1 %v739_v30  ;;  %1105 = vmatpush1.msra.mxu0 %v546_v31  ;;  %v697_v30 = vld [vmem:[#allocation9 + $0x738] sm:$0xff]  ;;  %v2823_v31 = vsel %vm291_vm0, %v319_v15, %v320_v16  ;;  %v672_v15 = vld [vmem:[#allocation9 + $0x670] sm:$0xff] }
  0xa1   : > { %1230 = vmatpush1.msra.mxu1 %v738_v32  ;;  %1106 = vmatprep.subr.mxu0 %v541_v34  ;;  %v2826_v32 = vsel %vm383_vm1, %v405_v17, %v406_v18  ;;  %v696_v34 = vld [vmem:[#allocation9 + $0x730] sm:$0xff]  ;;  %v667_v17 = vld [vmem:[#allocation9 + $0x648] sm:$0xff] }
  0xa2   : > { %1231 = vmatprep.subr.mxu1 %v733_v35  ;;  %926 = vmatprep.mubr.f32.mxu0 %v2768_v37  ;;  %v2829_v35 = vsel %vm340_vm2, %v362_v27, %v363_v28 }
  0xa3   : > { %1051 = vmatprep.mubr.f32.mxu1 %v2771_v38  ;;  %1107 = vmatpush1.msra.mxu0 %v540_v39  ;;  %v2832_v39 = vld [vmem:[%s2704_s26 + $0x10] sm:$0xff] }
  0xa4   : > { %1232 = vmatpush1.msra.mxu1 %v732_v40  ;;  %927 = vmatmul.mubr.f32.gmra.mxu0 %v2727_v6  ;;  %v499_v40 = vld [vmem:[#allocation9 + $0x108] sm:$0xff]  ;;  %v408_v48 = vrot.slane %v2832_v39, 3 }
  0xa5   : > { %1052 = vmatmul.mubr.f32.gmra.mxu1 %v2774_v41  ;;  %1108 = vmatprep.subr.mxu0 %v535_v44  ;;  %v690_v44 = vld [vmem:[#allocation9 + $0x700] sm:$0xff] }
  0xa6   : > { %1233 = vmatprep.subr.mxu1 %v727_v45  ;;  %1109 = vmatpush1.msra.mxu0 %v534_v46  ;;  %v493_v45 = vld [vmem:[#allocation9 + $0xd8] sm:$0xff]  ;;  %v2848_v63 = vsel %vm383_vm1, %v406_v18, %v408_v48 }
  0xa7   : > { %1234 = vmatpush1.msra.mxu1 %v726_v47  ;;  %1110 = vmatprep.subr.mxu0 %v529_v49  ;;  %v685_v46 = vld [vmem:[#allocation9 + $0x6d8] sm:$0xff]  ;;  %v322_v47 = vrot.slane %v2832_v39, 1  ;;  %v492_v49 = vld [vmem:[#allocation9 + $0xd0] sm:$0xff] }
  0xa8   : > { %1235 = vmatprep.subr.mxu1 %v721_v52  ;;  %932 = vmatprep.mubr.f32.mxu0 %v2785_v54  ;;  %v684_v52 = vld [vmem:[#allocation9 + $0x6d0] sm:$0xff] }
  0xa9   : > { %1057 = vmatprep.mubr.f32.mxu1 %v2788_v55  ;;  %1111 = vmatpush1.msra.mxu0 %v528_v56  ;;  %v679_v56 = vld [vmem:[#allocation9 + $0x6a8] sm:$0xff] }
  0xaa   : > { %1236 = vmatpush1.msra.mxu1 %v720_v57  ;;  %933 = vmatmul.mubr.f32.gmra.mxu0 %v2746_v21  ;;  %v365_v57 = vrot.slane %v2832_v39, 2 }
  0xab   : > { %1058 = vmatmul.mubr.f32.gmra.mxu1 %v2791_v58  ;;  %1112 = vmatprep.subr.mxu0 %v523_v61  ;;  %v2842_v61 = vld [vmem:[%s2704_s26 + $0x18] sm:$0xff] }
  0xac   : > { %1237 = vmatprep.subr.mxu1 %v715_v62  ;;  %1113 = vmatpush1.msra.mxu0 %v522_v0  ;;  %v2845_v62 = vsel %vm291_vm0, %v320_v16, %v322_v47  ;;  %v481_v0 = vld [vmem:[#allocation9 + $0x78] sm:$0xff]  ;;  %v475_v16 = vld [vmem:[#allocation9 + $0x48] sm:$0xff]  ;;  %v367_v18 = vrot.slane %v2842_v61, 2 }
  0xad   : > { %1238 = vmatpush1.msra.mxu1 %v714_v1  ;;  %1114 = vmatprep.subr.mxu0 %v517_v2  ;;  %v673_v1 = vld [vmem:[#allocation9 + $0x678] sm:$0xff]  ;;  %v2851_v2 = vsel %vm340_vm2, %v363_v28, %v365_v57 }
  0xae   : > { %1239 = vmatprep.subr.mxu1 %v709_v3  ;;  %938 = vmatprep.mubr.f32.mxu0 %v2804_v7  ;;  %v324_v3 = vrot.slane %v2842_v61, 1  ;;  %v469_v28 = vld [vmem:[#allocation9 + $0x18] sm:$0xff] }
  0xaf   : > { %1063 = vmatprep.mubr.f32.mxu1 %v2807_v9  ;;  %1115 = vmatpush1.msra.mxu0 %v516_v12  ;;  %v410_v12 = vrot.slane %v2842_v61, 3 }
  0xb0   : > { %1240 = vmatpush1.msra.mxu1 %v708_v13  ;;  %939 = vmatmul.mubr.f32.gmra.mxu0 %v2765_v36  ;;  %v480_v13 = vld [vmem:[#allocation9 + $0x70] sm:$0xff] }
  0xb1   : > { %1064 = vmatmul.mubr.f32.gmra.mxu1 %v2810_v14  ;;  %1116 = vmatprep.subr.mxu0 %v511_v19  ;;  %v474_v19 = vld [vmem:[#allocation9 + $0x40] sm:$0xff]  ;;  %v2867_v27 = vsel %vm383_vm1, %v408_v48, %v410_v12  ;;  %v274_v48 = vld [vmem:[%s2704_s26 + $0x28] sm:$0xff] }
  0xb2   : > { %1241 = vmatprep.subr.mxu1 %v703_v20  ;;  %1117 = vmatpush1.msra.mxu0 %v510_v24  ;;  %v666_v20 = vld [vmem:[#allocation9 + $0x640] sm:$0xff] }
  0xb3   : > { %1242 = vmatpush1.msra.mxu1 %v702_v25  ;;  %1118 = vmatprep.subr.mxu0 %v505_v29  ;;  %v2861_v24 = vld [vmem:[%s2704_s26 + $0x20] sm:$0xff]  ;;  %v2864_v25 = vsel %vm291_vm0, %v322_v47, %v324_v3  ;;  %v661_v29 = vld [vmem:[#allocation9 + $0x618] sm:$0xff] }
  0xb4   : > { %1243 = vmatprep.subr.mxu1 %v697_v30  ;;  %944 = vmatprep.mubr.f32.mxu0 %v2823_v31  ;;  %v2870_v30 = vsel %vm340_vm2, %v365_v57, %v367_v18  ;;  %v846_v47 = vld [vmem:[#allocation9 + $0xbe0] sm:$0xff] }
  0xb5   : > { %1069 = vmatprep.mubr.f32.mxu1 %v2826_v32  ;;  %1119 = vmatpush1.msra.mxu0 %v504_v33  ;;  %v326_v33 = vrot.slane %v2861_v24, 1 }
  0xb6   : > { %1244 = vmatpush1.msra.mxu1 %v696_v34  ;;  %945 = vmatmul.mubr.f32.gmra.mxu0 %v2798_v4  ;;  %v412_v34 = vrot.slane %v2861_v24, 3 }
  0xb7   : > { %1070 = vmatmul.mubr.f32.gmra.mxu1 %v2829_v35  ;;  %1120 = vmatprep.subr.mxu0 %v499_v40  ;;  %v468_v40 = vld [vmem:[#allocation9 + $0x10] sm:$0xff] }
  0xb8   : > { %1245 = vmatprep.subr.mxu1 %v691_v42  ;;  %1121 = vmatpush1.msra.mxu0 %v498_v43  ;;  %v660_v42 = vld [vmem:[#allocation9 + $0x610] sm:$0xff]  ;;  %v655_v43 = vld [vmem:[#allocation9 + $0x5e8] sm:$0xff] }
  0xb9   : > { %1246 = vmatpush1.msra.mxu1 %v690_v44  ;;  %1122 = vmatprep.subr.mxu0 %v493_v45  ;;  %v847_v44 = vld [vmem:[#allocation9 + $0xbe8] sm:$0xff]  ;;  %v369_v45 = vrot.slane %v2861_v24, 2 }
  0xba   : > { %1247 = vmatprep.subr.mxu1 %v685_v46  ;;  %1123 = vmatpush1.msra.mxu0 %v492_v49  ;;  %v654_v46 = vld [vmem:[#allocation9 + $0x5e0] sm:$0xff]  ;;  %v2881_v49 = vsel %vm291_vm0, %v324_v3, %v326_v33  ;;  %v643_v3 = vld [vmem:[#allocation9 + $0x588] sm:$0xff] }
  0xbb   : > { %1248 = vmatpush1.msra.mxu1 %v684_v52  ;;  %1124 = vmatprep.subr.mxu0 %v487_v53  ;;  %v2884_v52 = vsel %vm383_vm1, %v410_v12, %v412_v34  ;;  %v649_v53 = vld [vmem:[#allocation9 + $0x5b8] sm:$0xff]  ;;  %v2887_v57 = vsel %vm340_vm2, %v367_v18, %v369_v45  ;;  %v835_v12 = vld [vmem:[#allocation9 + $0xb88] sm:$0xff] }
  0xbc   : > { %1249 = vmatprep.subr.mxu1 %v679_v56  ;;  %1125 = vmatpush1.msra.mxu0 %v486_v59  ;;  %v841_v56 = vld [vmem:[#allocation9 + $0xbb8] sm:$0xff]  ;;  %v328_v59 = vrot.slane %v274_v48, 1 }
  0xbd   : > { %1250 = vmatpush1.msra.mxu1 %v678_v60  ;;  %950 = vmatprep.mubr.f32.mxu0 %v2845_v62  ;;  %v414_v60 = vrot.slane %v274_v48, 3 }
  0xbe   : > { %1075 = vmatprep.mubr.f32.mxu1 %v2848_v63  ;;  %1126 = vmatprep.subr.mxu0 %v481_v0  ;;  %v648_v0 = vld [vmem:[#allocation9 + $0x5b0] sm:$0xff] }
  0xbf   : > { %1251 = vmatprep.subr.mxu1 %v673_v1  ;;  %951 = vmatmul.mubr.f32.gmra.mxu0 %v2801_v5  ;;  %v840_v1 = vld [vmem:[#allocation9 + $0xbb0] sm:$0xff]  ;;  %v2897_v18 = vsel %vm383_vm1, %v412_v34, %v414_v60  ;;  %v823_v34 = vld [vmem:[#allocation9 + $0xb28] sm:$0xff]  ;;  %v613_v60 = vld [vmem:[#allocation9 + $0x498] sm:$0xff] }
  0xc0   : > { %1076 = vmatmul.mubr.f32.gmra.mxu1 %v2851_v2  ;;  %1127 = vmatpush1.msra.mxu0 %v480_v13  ;;  %v371_v13 = vrot.slane %v274_v48, 2  ;;  %v619_v48 = vld [vmem:[#allocation9 + $0x4c8] sm:$0xff] }
  0xc1   : > { %1252 = vmatpush1.msra.mxu1 %v672_v15  ;;  %1128 = vmatprep.subr.mxu0 %v475_v16  ;;  %v642_v15 = vld [vmem:[#allocation9 + $0x580] sm:$0xff] }
  0xc2   : > { %1253 = vmatprep.subr.mxu1 %v667_v17  ;;  %1129 = vmatpush1.msra.mxu0 %v474_v19  ;;  %v834_v16 = vld [vmem:[#allocation9 + $0xb80] sm:$0xff]  ;;  %v2894_v17 = vsel %vm291_vm0, %v326_v33, %v328_v59  ;;  %v637_v19 = vld [vmem:[#allocation9 + $0x558] sm:$0xff]  ;;  %v631_v33 = vld [vmem:[#allocation9 + $0x528] sm:$0xff] }
  0xc3   : > { %1254 = vmatpush1.msra.mxu1 %v666_v20  ;;  %956 = vmatprep.mubr.f32.mxu0 %v2864_v25  ;;  %v829_v20 = vld [vmem:[#allocation9 + $0xb58] sm:$0xff]  ;;  %v810_v59 = vld [vmem:[#allocation9 + $0xac0] sm:$0xff] }
  0xc4   : > { %1081 = vmatprep.mubr.f32.mxu1 %v2867_v27  ;;  %1130 = vmatprep.subr.mxu0 %v469_v28  ;;  %v2900_v28 = vsel %vm340_vm2, %v369_v45, %v371_v13  ;;  %v817_v45 = vld [vmem:[#allocation9 + $0xaf8] sm:$0xff]  ;;  %v799_v13 = vld [vmem:[#allocation9 + $0xa68] sm:$0xff] }
  0xc5   : > { %1255 = vmatprep.subr.mxu1 %v661_v29  ;;  %957 = vmatmul.mubr.f32.gmra.mxu0 %v2832_v39  ;;  %v636_v29 = vld [vmem:[#allocation9 + $0x550] sm:$0xff] }
  0xc6   : > { %1082 = vmatmul.mubr.f32.gmra.mxu1 %v2870_v30  ;;  %1131 = vmatpush1.msra.mxu0 %v468_v40  ;;  %v828_v40 = vld [vmem:[#allocation9 + $0xb50] sm:$0xff] }
  0xc7   : > { %1256 = vmatpush1.msra.mxu1 %v660_v42  ;;  %1132 = vmatprep.subr.mxu0 %v655_v43  ;;  %v630_v42 = vld [vmem:[#allocation9 + $0x520] sm:$0xff] }
  0xc8   : > { %1257 = vmatprep.subr.mxu1 %v847_v44  ;;  %1133 = vmatpush2.msra.mxu0 %v654_v46  ;;  %v822_v43 = vld [vmem:[#allocation9 + $0xb20] sm:$0xff]  ;;  %v625_v44 = vld [vmem:[#allocation9 + $0x4f8] sm:$0xff]  ;;  %v624_v46 = vld [vmem:[#allocation9 + $0x4f0] sm:$0xff] }
  0xc9   : > { %1258 = vmatpush2.msra.mxu1 %v846_v47  ;;  %962 = vmatprep.mubr.f32.mxu0 %v2881_v49  ;;  %v816_v47 = vld [vmem:[#allocation9 + $0xaf0] sm:$0xff] }
  0xca   : > { %1087 = vmatprep.mubr.f32.mxu1 %v2884_v52  ;;  %1134 = vmatprep.subr.mxu0 %v649_v53  ;;  %v811_v53 = vld [vmem:[#allocation9 + $0xac8] sm:$0xff] }
  0xcb   : > { %1259 = vmatprep.subr.mxu1 %v841_v56  ;;  %963 = vmatmul.mubr.f32.gmra.mxu0 %v2842_v61  ;;  %v618_v56 = vld [vmem:[#allocation9 + $0x4c0] sm:$0xff] }
  0xcc   : > { %1088 = vmatmul.mubr.f32.gmra.mxu1 %v2887_v57  ;;  %1135 = vmatpush2.msra.mxu0 %v648_v0  ;;  %v805_v0 = vld [vmem:[#allocation9 + $0xa98] sm:$0xff] }
  0xcd   : > { %1260 = vmatpush2.msra.mxu1 %v840_v1  ;;  %1136 = vmatprep.subr.mxu0 %v643_v3  ;;  %v612_v1 = vld [vmem:[#allocation9 + $0x490] sm:$0xff] }
  0xce   : > { %1261 = vmatprep.subr.mxu1 %v835_v12  ;;  %1137 = vmatpush2.msra.mxu0 %v642_v15  ;;  %v804_v3 = vld [vmem:[#allocation9 + $0xa90] sm:$0xff]  ;;  %v607_v12 = vld [vmem:[#allocation9 + $0x468] sm:$0xff]  ;;  %v606_v15 = vld [vmem:[#allocation9 + $0x460] sm:$0xff] }
  0xcf   : > { %1262 = vmatpush2.msra.mxu1 %v834_v16  ;;  %968 = vmatprep.mubr.f32.mxu0 %v2894_v17  ;;  %v798_v16 = vld [vmem:[#allocation9 + $0xa60] sm:$0xff] }
  0xd0   : > { %1093 = vmatprep.mubr.f32.mxu1 %v2897_v18  ;;  %1138 = vmatprep.subr.mxu0 %v637_v19  ;;  %v601_v19 = vld [vmem:[#allocation9 + $0x438] sm:$0xff] }
  0xd1   : > { %1263 = vmatprep.subr.mxu1 %v829_v20  ;;  %969 = vmatmul.mubr.f32.gmra.mxu0 %v2861_v24  ;;  %v793_v20 = vld [vmem:[#allocation9 + $0xa38] sm:$0xff] }
  0xd2   : > { %1094 = vmatmul.mubr.f32.gmra.mxu1 %v2900_v28  ;;  %1139 = vmatpush2.msra.mxu0 %v636_v29  ;;  %v600_v29 = vld [vmem:[#allocation9 + $0x430] sm:$0xff] }
  0xd3   : > { %1264 = vmatpush2.msra.mxu1 %v828_v40  ;;  %1140 = vmatprep.subr.mxu0 %v631_v33  ;;  %v792_v40 = vld [vmem:[#allocation9 + $0xa30] sm:$0xff]  ;;  %v595_v33 = vld [vmem:[#allocation9 + $0x408] sm:$0xff] }
  0xd4   : > { %1265 = vmatprep.subr.mxu1 %v823_v34  ;;  %1141 = vmatpush2.msra.mxu0 %v630_v42  ;;  %v787_v34 = vld [vmem:[#allocation9 + $0xa08] sm:$0xff]  ;;  %v594_v42 = vld [vmem:[#allocation9 + $0x400] sm:$0xff] }
  0xd5   : > { %1266 = vmatpush2.msra.mxu1 %v822_v43  ;;  %1142 = vmatprep.subr.mxu0 %v625_v44  ;;  %v786_v43 = vld [vmem:[#allocation9 + $0xa00] sm:$0xff]  ;;  %v589_v44 = vld [vmem:[#allocation9 + $0x3d8] sm:$0xff] }
  0xd6   : > { %1267 = vmatprep.subr.mxu1 %v817_v45  ;;  %1143 = vmatpush2.msra.mxu0 %v624_v46  ;;  %v781_v45 = vld [vmem:[#allocation9 + $0x9d8] sm:$0xff]  ;;  %v588_v46 = vld [vmem:[#allocation9 + $0x3d0] sm:$0xff] }
  0xd7   : > { %1268 = vmatpush2.msra.mxu1 %v816_v47  ;;  %1144 = vmatprep.subr.mxu0 %v619_v48  ;;  %v780_v47 = vld [vmem:[#allocation9 + $0x9d0] sm:$0xff]  ;;  %v583_v48 = vld [vmem:[#allocation9 + $0x3a8] sm:$0xff] }
  0xd8   : > { %1269 = vmatprep.subr.mxu1 %v811_v53  ;;  %1145 = vmatpush2.msra.mxu0 %v618_v56  ;;  %v775_v53 = vld [vmem:[#allocation9 + $0x9a8] sm:$0xff]  ;;  %v582_v56 = vld [vmem:[#allocation9 + $0x3a0] sm:$0xff] }
  0xd9   : > { %1270 = vmatpush2.msra.mxu1 %v810_v59  ;;  %1146 = vmatprep.subr.mxu0 %v613_v60  ;;  %v774_v59 = vld [vmem:[#allocation9 + $0x9a0] sm:$0xff]  ;;  %v577_v60 = vld [vmem:[#allocation9 + $0x378] sm:$0xff] }
  0xda   : > { %1271 = vmatprep.subr.mxu1 %v805_v0  ;;  %1147 = vmatpush2.msra.mxu0 %v612_v1  ;;  %v769_v0 = vld [vmem:[#allocation9 + $0x978] sm:$0xff]  ;;  %v576_v1 = vld [vmem:[#allocation9 + $0x370] sm:$0xff] }
  0xdb   : > { %1272 = vmatpush2.msra.mxu1 %v804_v3  ;;  %1148 = vmatprep.subr.mxu0 %v607_v12  ;;  %v768_v3 = vld [vmem:[#allocation9 + $0x970] sm:$0xff]  ;;  %v571_v12 = vld [vmem:[#allocation9 + $0x348] sm:$0xff] }
  0xdc   : > { %1273 = vmatprep.subr.mxu1 %v799_v13  ;;  %1149 = vmatpush2.msra.mxu0 %v606_v15  ;;  %v763_v13 = vld [vmem:[#allocation9 + $0x948] sm:$0xff]  ;;  %v570_v15 = vld [vmem:[#allocation9 + $0x340] sm:$0xff] }
  0xdd   : > { %1274 = vmatpush2.msra.mxu1 %v798_v16  ;;  %1150 = vmatprep.subr.mxu0 %v601_v19  ;;  %v762_v16 = vld [vmem:[#allocation9 + $0x940] sm:$0xff]  ;;  %v565_v19 = vld [vmem:[#allocation9 + $0x318] sm:$0xff] }
  0xde   : > { %1275 = vmatprep.subr.mxu1 %v793_v20  ;;  %1151 = vmatpush2.msra.mxu0 %v600_v29  ;;  %v757_v20 = vld [vmem:[#allocation9 + $0x918] sm:$0xff]  ;;  %v564_v29 = vld [vmem:[#allocation9 + $0x310] sm:$0xff] }
  0xdf   : > { %1276 = vmatpush2.msra.mxu1 %v792_v40  ;;  %1152 = vmatprep.subr.mxu0 %v595_v33  ;;  %v756_v40 = vld [vmem:[#allocation9 + $0x910] sm:$0xff]  ;;  %v561_v33 = vld [vmem:[#allocation9 + $0x2f8] sm:$0xff] }
  0xe0   : > { %1277 = vmatprep.subr.mxu1 %v787_v34  ;;  %1153 = vmatpush2.msra.mxu0 %v594_v42  ;;  %v753_v34 = vld [vmem:[#allocation9 + $0x8f8] sm:$0xff]  ;;  %v560_v42 = vld [vmem:[#allocation9 + $0x2f0] sm:$0xff] }
  0xe1   : > { %1278 = vmatpush2.msra.mxu1 %v786_v43  ;;  %1154 = vmatprep.subr.mxu0 %v589_v44  ;;  %v752_v43 = vld [vmem:[#allocation9 + $0x8f0] sm:$0xff]  ;;  %v555_v44 = vld [vmem:[#allocation9 + $0x2c8] sm:$0xff] }
  0xe2   : > { %1279 = vmatprep.subr.mxu1 %v781_v45  ;;  %1155 = vmatpush2.msra.mxu0 %v588_v46  ;;  %v747_v45 = vld [vmem:[#allocation9 + $0x8c8] sm:$0xff]  ;;  %v554_v46 = vld [vmem:[#allocation9 + $0x2c0] sm:$0xff] }
  0xe3   : > { %1280 = vmatpush2.msra.mxu1 %v780_v47  ;;  %1156 = vmatprep.subr.mxu0 %v583_v48  ;;  %v746_v47 = vld [vmem:[#allocation9 + $0x8c0] sm:$0xff]  ;;  %v549_v48 = vld [vmem:[#allocation9 + $0x298] sm:$0xff] }
  0xe4   : > { %1281 = vmatprep.subr.mxu1 %v775_v53  ;;  %1157 = vmatpush2.msra.mxu0 %v582_v56  ;;  %v741_v53 = vld [vmem:[#allocation9 + $0x898] sm:$0xff]  ;;  %v740_v56 = vld [vmem:[#allocation9 + $0x890] sm:$0xff] }
  0xe5   : > { %1282 = vmatpush2.msra.mxu1 %v774_v59  ;;  %1158 = vmatprep.subr.mxu0 %v577_v60  ;;  %v543_v59 = vld [vmem:[#allocation9 + $0x268] sm:$0xff] }
  0xe6   : > { %1283 = vmatprep.subr.mxu1 %v769_v0  ;;  %1159 = vmatpush2.msra.mxu0 %v576_v1  ;;  %v735_v60 = vld [vmem:[#allocation9 + $0x868] sm:$0xff]  ;;  %v542_v0 = vld [vmem:[#allocation9 + $0x260] sm:$0xff] }
  0xe7   : > { %1284 = vmatpush2.msra.mxu1 %v768_v3  ;;  %1160 = vmatprep.subr.mxu0 %v571_v12  ;;  %v734_v1 = vld [vmem:[#allocation9 + $0x860] sm:$0xff]  ;;  %v537_v3 = vld [vmem:[#allocation9 + $0x238] sm:$0xff] }
  0xe8   : > { %1285 = vmatprep.subr.mxu1 %v763_v13  ;;  %1161 = vmatpush2.msra.mxu0 %v570_v15  ;;  %v729_v12 = vld [vmem:[#allocation9 + $0x838] sm:$0xff]  ;;  %v728_v13 = vld [vmem:[#allocation9 + $0x830] sm:$0xff]  ;;  %v531_v15 = vld [vmem:[#allocation9 + $0x208] sm:$0xff] }
  0xe9   : > { %1286 = vmatpush2.msra.mxu1 %v762_v16  ;;  %1162 = vmatprep.subr.mxu0 %v565_v19  ;;  %v723_v16 = vld [vmem:[#allocation9 + $0x808] sm:$0xff]  ;;  %v530_v19 = vld [vmem:[#allocation9 + $0x200] sm:$0xff] }
  0xea   : > { %1287 = vmatprep.subr.mxu1 %v757_v20  ;;  %1163 = vmatpush2.msra.mxu0 %v564_v29  ;;  %v722_v20 = vld [vmem:[#allocation9 + $0x800] sm:$0xff]  ;;  %v525_v29 = vld [vmem:[#allocation9 + $0x1d8] sm:$0xff] }
  0xeb   : > { %1164 = vmatprep.mubr.f32.mxu0 %v2730_v8  ;;  %1288 = vmatpush2.msra.mxu1 %v756_v40  ;;  %v717_v40 = vld [vmem:[#allocation9 + $0x7d8] sm:$0xff] }
  0xec   : > { %1289 = vmatprep.mubr.f32.mxu1 %v2733_v10  ;;  %1165 = vmatmul.mubr.f32.vlgmr.msra.gmra.mxu0 %v2715_v50  ;;  %v548_v50 = vld [vmem:[#allocation9 + $0x290] sm:$0xff] }
  0xed   : > { %1290 = vmatmul.mubr.f32.vlgmr.msra.gmra.mxu1 %v2736_v11  ;;  %1350 = vmatprep.subr.mxu0 %v561_v33  ;;  %v716_v33 = vld [vmem:[#allocation9 + $0x7d0] sm:$0xff] }
  0xee   : > { %1475 = vmatprep.subr.mxu1 %v753_v34  ;;  %1351 = vmatpush1.msra.mxu0 %v560_v42  ;;  %v519_v34 = vld [vmem:[#allocation9 + $0x1a8] sm:$0xff] }
  0xef   : > { %1476 = vmatpush1.msra.mxu1 %v752_v43  ;;  %1352 = vmatprep.subr.mxu0 %v555_v44  ;;  %v711_v42 = vld [vmem:[#allocation9 + $0x7a8] sm:$0xff]  ;;  %v518_v43 = vld [vmem:[#allocation9 + $0x1a0] sm:$0xff] }
  0xf0   : > { %1477 = vmatprep.subr.mxu1 %v747_v45  ;;  %1170 = vmatprep.mubr.f32.mxu0 %v2749_v22  ;;  %v710_v44 = vld [vmem:[#allocation9 + $0x7a0] sm:$0xff]  ;;  %v513_v45 = vld [vmem:[#allocation9 + $0x178] sm:$0xff] }
  0xf1   : > { %1295 = vmatprep.mubr.f32.mxu1 %v2752_v23  ;;  %1353 = vmatpush1.msra.mxu0 %v554_v46  ;;  %v705_v46 = vld [vmem:[#allocation9 + $0x778] sm:$0xff] }
  0xf2   : > { %1478 = vmatpush1.msra.mxu1 %v746_v47  ;;  %1171 = vmatmul.mubr.f32.gmra.mxu0 %v2718_v51  ;;  %v536_v51 = vld [vmem:[#allocation9 + $0x230] sm:$0xff] }
  0xf3   : > { %1296 = vmatmul.mubr.f32.gmra.mxu1 %v2755_v26  ;;  %1354 = vmatprep.subr.mxu0 %v549_v48  ;;  %v704_v47 = vld [vmem:[#allocation9 + $0x770] sm:$0xff]  ;;  %v507_v48 = vld [vmem:[#allocation9 + $0x148] sm:$0xff] }
  0xf4   : > { %1479 = vmatprep.subr.mxu1 %v741_v53  ;;  %1355 = vmatpush1.msra.mxu0 %v548_v50  ;;  %v699_v53 = vld [vmem:[#allocation9 + $0x748] sm:$0xff]  ;;  %v506_v50 = vld [vmem:[#allocation9 + $0x140] sm:$0xff] }
  0xf5   : > { %1480 = vmatpush1.msra.mxu1 %v740_v56  ;;  %1356 = vmatprep.subr.mxu0 %v543_v59  ;;  %v698_v56 = vld [vmem:[#allocation9 + $0x740] sm:$0xff]  ;;  %v501_v59 = vld [vmem:[#allocation9 + $0x118] sm:$0xff] }
  0xf6   : > { %1481 = vmatprep.subr.mxu1 %v735_v60  ;;  %1176 = vmatprep.mubr.f32.mxu0 %v2768_v37  ;;  %v693_v60 = vld [vmem:[#allocation9 + $0x718] sm:$0xff] }
  0xf7   : > { %1301 = vmatprep.mubr.f32.mxu1 %v2771_v38  ;;  %1357 = vmatpush1.msra.mxu0 %v542_v0  ;;  %v692_v0 = vld [vmem:[#allocation9 + $0x710] sm:$0xff] }
  0xf8   : > { %1482 = vmatpush1.msra.mxu1 %v734_v1  ;;  %1177 = vmatmul.mubr.f32.gmra.mxu0 %v2727_v6  ;;  %v524_v6 = vld [vmem:[#allocation9 + $0x1d0] sm:$0xff]  ;;  %v495_v1 = vld [vmem:[#allocation9 + $0xe8] sm:$0xff] }
  0xf9   : > { %1302 = vmatmul.mubr.f32.gmra.mxu1 %v2774_v41  ;;  %1358 = vmatprep.subr.mxu0 %v537_v3  ;;  %v687_v3 = vld [vmem:[#allocation9 + $0x6e8] sm:$0xff] }
  0xfa   : > { %1483 = vmatprep.subr.mxu1 %v729_v12  ;;  %1359 = vmatpush1.msra.mxu0 %v536_v51  ;;  %v494_v12 = vld [vmem:[#allocation9 + $0xe0] sm:$0xff] }
  0xfb   : > { %1484 = vmatpush1.msra.mxu1 %v728_v13  ;;  %1360 = vmatprep.subr.mxu0 %v531_v15  ;;  %v686_v51 = vld [vmem:[#allocation9 + $0x6e0] sm:$0xff]  ;;  %v489_v13 = vld [vmem:[#allocation9 + $0xb8] sm:$0xff] }
  0xfc   : > { %1485 = vmatprep.subr.mxu1 %v723_v16  ;;  %1182 = vmatprep.mubr.f32.mxu0 %v2785_v54  ;;  %v681_v15 = vld [vmem:[#allocation9 + $0x6b8] sm:$0xff]  ;;  %v680_v16 = vld [vmem:[#allocation9 + $0x6b0] sm:$0xff] }
  0xfd   : > { %1307 = vmatprep.mubr.f32.mxu1 %v2788_v55  ;;  %1361 = vmatpush1.msra.mxu0 %v530_v19  ;;  %v483_v19 = vld [vmem:[#allocation9 + $0x88] sm:$0xff] }
  0xfe   : > { %1486 = vmatpush1.msra.mxu1 %v722_v20  ;;  %1183 = vmatmul.mubr.f32.gmra.mxu0 %v2746_v21  ;;  %v512_v21 = vld [vmem:[#allocation9 + $0x170] sm:$0xff]  ;;  %v675_v20 = vld [vmem:[#allocation9 + $0x688] sm:$0xff] }
  0xff   : > { %1308 = vmatmul.mubr.f32.gmra.mxu1 %v2791_v58  ;;  %1362 = vmatprep.subr.mxu0 %v525_v29  ;;  %v482_v29 = vld [vmem:[#allocation9 + $0x80] sm:$0xff] }
 0x100   : > { %1487 = vmatprep.subr.mxu1 %v717_v40  ;;  %1363 = vmatpush1.msra.mxu0 %v524_v6  ;;  %v674_v40 = vld [vmem:[#allocation9 + $0x680] sm:$0xff]  ;;  %v477_v6 = vld [vmem:[#allocation9 + $0x58] sm:$0xff] }
 0x101   : > { %1488 = vmatpush1.msra.mxu1 %v716_v33  ;;  %1364 = vmatprep.subr.mxu0 %v519_v34  ;;  %v669_v33 = vld [vmem:[#allocation9 + $0x658] sm:$0xff]  ;;  %v668_v34 = vld [vmem:[#allocation9 + $0x650] sm:$0xff] }
 0x102   : > { %1489 = vmatprep.subr.mxu1 %v711_v42  ;;  %1188 = vmatprep.mubr.f32.mxu0 %v2804_v7  ;;  %v471_v42 = vld [vmem:[#allocation9 + $0x28] sm:$0xff] }
 0x103   : > { %1313 = vmatprep.mubr.f32.mxu1 %v2807_v9  ;;  %1365 = vmatpush1.msra.mxu0 %v518_v43  ;;  %v663_v43 = vld [vmem:[#allocation9 + $0x628] sm:$0xff] }
 0x104   : > { %1490 = vmatpush1.msra.mxu1 %v710_v44  ;;  %1189 = vmatmul.mubr.f32.gmra.mxu0 %v2765_v36  ;;  %v500_v36 = vld [vmem:[#allocation9 + $0x110] sm:$0xff]  ;;  %v470_v44 = vld [vmem:[#allocation9 + $0x20] sm:$0xff] }
 0x105   : > { %1314 = vmatmul.mubr.f32.gmra.mxu1 %v2810_v14  ;;  %1366 = vmatprep.subr.mxu0 %v513_v45  ;;  %v662_v45 = vld [vmem:[#allocation9 + $0x620] sm:$0xff] }
 0x106   : > { %1491 = vmatprep.subr.mxu1 %v705_v46  ;;  %1367 = vmatpush1.msra.mxu0 %v512_v21  ;;  %v657_v46 = vld [vmem:[#allocation9 + $0x5f8] sm:$0xff] }
 0x107   : > { %1492 = vmatpush1.msra.mxu1 %v704_v47  ;;  %1368 = vmatprep.subr.mxu0 %v507_v48  ;;  %v849_v21 = vld [vmem:[#allocation9 + $0xbf8] sm:$0xff]  ;;  %v848_v47 = vld [vmem:[#allocation9 + $0xbf0] sm:$0xff]  ;;  %v651_v48 = vld [vmem:[#allocation9 + $0x5c8] sm:$0xff] }
 0x108   : > { %1493 = vmatprep.subr.mxu1 %v699_v53  ;;  %1194 = vmatprep.mubr.f32.mxu0 %v2823_v31  ;;  %v843_v53 = vld [vmem:[#allocation9 + $0xbc8] sm:$0xff] }
 0x109   : > { %1319 = vmatprep.mubr.f32.mxu1 %v2826_v32  ;;  %1369 = vmatpush1.msra.mxu0 %v506_v50  ;;  %v650_v50 = vld [vmem:[#allocation9 + $0x5c0] sm:$0xff] }
 0x10a   : > { %1494 = vmatpush1.msra.mxu1 %v698_v56  ;;  %1195 = vmatmul.mubr.f32.gmra.mxu0 %v2798_v4  ;;  %v488_v4 = vld [vmem:[#allocation9 + $0xb0] sm:$0xff]  ;;  %v842_v56 = vld [vmem:[#allocation9 + $0xbc0] sm:$0xff] }
 0x10b   : > { %1320 = vmatmul.mubr.f32.gmra.mxu1 %v2829_v35  ;;  %1370 = vmatprep.subr.mxu0 %v501_v59  ;;  %v645_v59 = vld [vmem:[#allocation9 + $0x598] sm:$0xff] }
 0x10c   : > { %1495 = vmatprep.subr.mxu1 %v693_v60  ;;  %1371 = vmatpush1.msra.mxu0 %v500_v36  ;;  %v837_v60 = vld [vmem:[#allocation9 + $0xb98] sm:$0xff]  ;;  %v836_v36 = vld [vmem:[#allocation9 + $0xb90] sm:$0xff] }
 0x10d   : > { %1496 = vmatpush1.msra.mxu1 %v692_v0  ;;  %1372 = vmatprep.subr.mxu0 %v495_v1  ;;  %v639_v0 = vld [vmem:[#allocation9 + $0x568] sm:$0xff] }
 0x10e   : > { %1497 = vmatprep.subr.mxu1 %v687_v3  ;;  %1200 = vmatprep.mubr.f32.mxu0 %v2845_v62  ;;  %v831_v1 = vld [vmem:[#allocation9 + $0xb68] sm:$0xff]  ;;  %v638_v3 = vld [vmem:[#allocation9 + $0x560] sm:$0xff] }
 0x10f   : > { %1325 = vmatprep.mubr.f32.mxu1 %v2848_v63  ;;  %1373 = vmatpush1.msra.mxu0 %v494_v12  ;;  %v830_v12 = vld [vmem:[#allocation9 + $0xb60] sm:$0xff] }
 0x110   : > { %1498 = vmatpush1.msra.mxu1 %v686_v51  ;;  %1201 = vmatmul.mubr.f32.gmra.mxu0 %v2801_v5  ;;  %v476_v5 = vld [vmem:[#allocation9 + $0x50] sm:$0xff]  ;;  %v633_v51 = vld [vmem:[#allocation9 + $0x538] sm:$0xff] }
 0x111   : > { %1326 = vmatmul.mubr.f32.gmra.mxu1 %v2851_v2  ;;  %1374 = vmatprep.subr.mxu0 %v489_v13  ;;  %v825_v13 = vld [vmem:[#allocation9 + $0xb38] sm:$0xff] }
 0x112   : > { %1499 = vmatprep.subr.mxu1 %v681_v15  ;;  %1375 = vmatpush1.msra.mxu0 %v488_v4  ;;  %v632_v15 = vld [vmem:[#allocation9 + $0x530] sm:$0xff] }
 0x113   : > { %1500 = vmatpush1.msra.mxu1 %v680_v16  ;;  %1376 = vmatprep.subr.mxu0 %v483_v19  ;;  %v824_v4 = vld [vmem:[#allocation9 + $0xb30] sm:$0xff]  ;;  %v627_v16 = vld [vmem:[#allocation9 + $0x508] sm:$0xff]  ;;  %v626_v19 = vld [vmem:[#allocation9 + $0x500] sm:$0xff] }
 0x114   : > { %1501 = vmatprep.subr.mxu1 %v675_v20  ;;  %1206 = vmatprep.mubr.f32.mxu0 %v2864_v25  ;;  %v818_v20 = vld [vmem:[#allocation9 + $0xb00] sm:$0xff] }
 0x115   : > { %1331 = vmatprep.mubr.f32.mxu1 %v2867_v27  ;;  %1377 = vmatpush1.msra.mxu0 %v482_v29  ;;  %v621_v29 = vld [vmem:[#allocation9 + $0x4d8] sm:$0xff] }
 0x116   : > { %1502 = vmatpush1.msra.mxu1 %v674_v40  ;;  %1207 = vmatmul.mubr.f32.gmra.mxu0 %v2832_v39  ;;  %v656_v39 = vld [vmem:[#allocation9 + $0x5f0] sm:$0xff]  ;;  %v813_v40 = vld [vmem:[#allocation9 + $0xad8] sm:$0xff] }
 0x117   : > { %1332 = vmatmul.mubr.f32.gmra.mxu1 %v2870_v30  ;;  %1378 = vmatprep.subr.mxu0 %v477_v6  ;;  %v620_v6 = vld [vmem:[#allocation9 + $0x4d0] sm:$0xff] }
 0x118   : > { %1503 = vmatprep.subr.mxu1 %v669_v33  ;;  %1379 = vmatpush1.msra.mxu0 %v476_v5  ;;  %v812_v33 = vld [vmem:[#allocation9 + $0xad0] sm:$0xff]  ;;  %v615_v5 = vld [vmem:[#allocation9 + $0x4a8] sm:$0xff] }
 0x119   : > { %1504 = vmatpush1.msra.mxu1 %v668_v34  ;;  %1380 = vmatprep.subr.mxu0 %v471_v42  ;;  %v807_v34 = vld [vmem:[#allocation9 + $0xaa8] sm:$0xff]  ;;  %v614_v42 = vld [vmem:[#allocation9 + $0x4a0] sm:$0xff] }
 0x11a   : > { %1505 = vmatprep.subr.mxu1 %v663_v43  ;;  %1212 = vmatprep.mubr.f32.mxu0 %v2881_v49  ;;  %v806_v43 = vld [vmem:[#allocation9 + $0xaa0] sm:$0xff] }
 0x11b   : > { %1337 = vmatprep.mubr.f32.mxu1 %v2884_v52  ;;  %1381 = vmatpush1.msra.mxu0 %v470_v44  ;;  %v609_v44 = vld [vmem:[#allocation9 + $0x478] sm:$0xff] }
 0x11c   : > { %1506 = vmatpush1.msra.mxu1 %v662_v45  ;;  %1213 = vmatmul.mubr.f32.gmra.mxu0 %v2842_v61  ;;  %v644_v61 = vld [vmem:[#allocation9 + $0x590] sm:$0xff]  ;;  %v801_v45 = vld [vmem:[#allocation9 + $0xa78] sm:$0xff] }
 0x11d   : > { %1338 = vmatmul.mubr.f32.gmra.mxu1 %v2887_v57  ;;  %1382 = vmatprep.subr.mxu0 %v657_v46  ;;  %v608_v46 = vld [vmem:[#allocation9 + $0x470] sm:$0xff] }
 0x11e   : > { %1507 = vmatprep.subr.mxu1 %v849_v21  ;;  %1383 = vmatpush2.msra.mxu0 %v656_v39  ;;  %v800_v21 = vld [vmem:[#allocation9 + $0xa70] sm:$0xff]  ;;  %v603_v39 = vld [vmem:[#allocation9 + $0x448] sm:$0xff] }
 0x11f   : > { %1508 = vmatpush2.msra.mxu1 %v848_v47  ;;  %1384 = vmatprep.subr.mxu0 %v651_v48  ;;  %v795_v47 = vld [vmem:[#allocation9 + $0xa48] sm:$0xff]  ;;  %v602_v48 = vld [vmem:[#allocation9 + $0x440] sm:$0xff] }
 0x120   : > { %1509 = vmatprep.subr.mxu1 %v843_v53  ;;  %1218 = vmatprep.mubr.f32.mxu0 %v2894_v17  ;;  %v794_v53 = vld [vmem:[#allocation9 + $0xa40] sm:$0xff] }
 0x121   : > { %1343 = vmatprep.mubr.f32.mxu1 %v2897_v18  ;;  %1385 = vmatpush2.msra.mxu0 %v650_v50  ;;  %v597_v50 = vld [vmem:[#allocation9 + $0x418] sm:$0xff] }
 0x122   : > { %1510 = vmatpush2.msra.mxu1 %v842_v56  ;;  %1219 = vmatmul.mubr.f32.gmra.mxu0 %v2861_v24  ;;  %v819_v24 = vld [vmem:[#allocation9 + $0xb08] sm:$0xff]  ;;  %v789_v56 = vld [vmem:[#allocation9 + $0xa18] sm:$0xff] }
 0x123   : > { %1344 = vmatmul.mubr.f32.gmra.mxu1 %v2900_v28  ;;  %1386 = vmatprep.subr.mxu0 %v645_v59  ;;  %v596_v59 = vld [vmem:[#allocation9 + $0x410] sm:$0xff] }
 0x124   : > { %1511 = vmatprep.subr.mxu1 %v837_v60  ;;  %1387 = vmatpush2.msra.mxu0 %v644_v61  ;;  %v788_v60 = vld [vmem:[#allocation9 + $0xa10] sm:$0xff]  ;;  %v591_v61 = vld [vmem:[#allocation9 + $0x3e8] sm:$0xff] }
 0x125   : > { %1512 = vmatpush2.msra.mxu1 %v836_v36  ;;  %1388 = vmatprep.subr.mxu0 %v639_v0  ;;  %v783_v36 = vld [vmem:[#allocation9 + $0x9e8] sm:$0xff]  ;;  %v590_v0 = vld [vmem:[#allocation9 + $0x3e0] sm:$0xff] }
 0x126   : > { %1513 = vmatprep.subr.mxu1 %v831_v1  ;;  %1389 = vmatpush2.msra.mxu0 %v638_v3  ;;  %v782_v1 = vld [vmem:[#allocation9 + $0x9e0] sm:$0xff]  ;;  %v585_v3 = vld [vmem:[#allocation9 + $0x3b8] sm:$0xff] }
 0x127   : > { %1514 = vmatpush2.msra.mxu1 %v830_v12  ;;  %1390 = vmatprep.subr.mxu0 %v633_v51  ;;  %v777_v12 = vld [vmem:[#allocation9 + $0x9b8] sm:$0xff]  ;;  %v584_v51 = vld [vmem:[#allocation9 + $0x3b0] sm:$0xff] }
 0x128   : > { %1515 = vmatprep.subr.mxu1 %v825_v13  ;;  %1391 = vmatpush2.msra.mxu0 %v632_v15  ;;  %v776_v13 = vld [vmem:[#allocation9 + $0x9b0] sm:$0xff]  ;;  %v579_v15 = vld [vmem:[#allocation9 + $0x388] sm:$0xff] }
 0x129   : > { %1516 = vmatpush2.msra.mxu1 %v824_v4  ;;  %1392 = vmatprep.subr.mxu0 %v627_v16  ;;  %v771_v4 = vld [vmem:[#allocation9 + $0x988] sm:$0xff]  ;;  %v578_v16 = vld [vmem:[#allocation9 + $0x380] sm:$0xff] }
 0x12a   : > { %1517 = vmatprep.subr.mxu1 %v819_v24  ;;  %1393 = vmatpush2.msra.mxu0 %v626_v19  ;;  %v770_v24 = vld [vmem:[#allocation9 + $0x980] sm:$0xff]  ;;  %v573_v19 = vld [vmem:[#allocation9 + $0x358] sm:$0xff] }
 0x12b   : > { %1518 = vmatpush2.msra.mxu1 %v818_v20  ;;  %1394 = vmatprep.subr.mxu0 %v621_v29  ;;  %v765_v20 = vld [vmem:[#allocation9 + $0x958] sm:$0xff]  ;;  %v572_v29 = vld [vmem:[#allocation9 + $0x350] sm:$0xff] }
 0x12c   : > { %1519 = vmatprep.subr.mxu1 %v813_v40  ;;  %1395 = vmatpush2.msra.mxu0 %v620_v6  ;;  %v764_v40 = vld [vmem:[#allocation9 + $0x950] sm:$0xff]  ;;  %v567_v6 = vld [vmem:[#allocation9 + $0x328] sm:$0xff] }
 0x12d   : > { %1520 = vmatpush2.msra.mxu1 %v812_v33  ;;  %1396 = vmatprep.subr.mxu0 %v615_v5  ;;  %v759_v33 = vld [vmem:[#allocation9 + $0x928] sm:$0xff]  ;;  %v566_v5 = vld [vmem:[#allocation9 + $0x320] sm:$0xff] }
 0x12e   : > { %1521 = vmatprep.subr.mxu1 %v807_v34  ;;  %1397 = vmatpush2.msra.mxu0 %v614_v42  ;;  %v758_v34 = vld [vmem:[#allocation9 + $0x920] sm:$0xff] }
 0x12f   : > { %1522 = vmatpush2.msra.mxu1 %v806_v43  ;;  %1398 = vmatprep.subr.mxu0 %v609_v44  ;;  %v2357_v42 = vld [vmem:[%s2697_s11] sm:$0xff]  ;;  %v2358_v43 = vld [vmem:[%s2697_s11 + $0x8] sm:$0xff] }
 0x130   : > { %1523 = vmatprep.subr.mxu1 %v801_v45  ;;  %1399 = vmatpush2.msra.mxu0 %v608_v46 }
 0x131   : > { %1524 = vmatpush2.msra.mxu1 %v800_v21  ;;  %1400 = vmatprep.subr.mxu0 %v603_v39 }
 0x132   : > { %1525 = vmatprep.subr.mxu1 %v795_v47  ;;  %1401 = vmatpush2.msra.mxu0 %v602_v48 }
 0x133   : > { %1526 = vmatpush2.msra.mxu1 %v794_v53  ;;  %1402 = vmatprep.subr.mxu0 %v597_v50 }
 0x134   : > { %1527 = vmatprep.subr.mxu1 %v789_v56  ;;  %1403 = vmatpush2.msra.mxu0 %v596_v59 }
 0x135   : > { %1528 = vmatpush2.msra.mxu1 %v788_v60  ;;  %1404 = vmatprep.subr.mxu0 %v591_v61 }
 0x136   : > { %1529 = vmatprep.subr.mxu1 %v783_v36  ;;  %1405 = vmatpush2.msra.mxu0 %v590_v0 }
 0x137   : > { %1530 = vmatpush2.msra.mxu1 %v782_v1  ;;  %1406 = vmatprep.subr.mxu0 %v585_v3 }
 0x138   : > { %1531 = vmatprep.subr.mxu1 %v777_v12  ;;  %1407 = vmatpush2.msra.mxu0 %v584_v51 }
 0x139   : > { %1532 = vmatpush2.msra.mxu1 %v776_v13  ;;  %1408 = vmatprep.subr.mxu0 %v579_v15 }
 0x13a   : > { %1533 = vmatprep.subr.mxu1 %v771_v4  ;;  %1409 = vmatpush2.msra.mxu0 %v578_v16 }
 0x13b   : > { %1534 = vmatpush2.msra.mxu1 %v770_v24  ;;  %1410 = vmatprep.subr.mxu0 %v573_v19 }
 0x13c   : > { %1535 = vmatprep.subr.mxu1 %v765_v20  ;;  %1411 = vmatpush2.msra.mxu0 %v572_v29 }
 0x13d   : > { %1536 = vmatpush2.msra.mxu1 %v764_v40  ;;  %1412 = vmatprep.subr.mxu0 %v567_v6 }
 0x13e   : > { %1537 = vmatprep.subr.mxu1 %v759_v33  ;;  %1413 = vmatpush2.msra.mxu0 %v566_v5 }
 0x13f   : > { %1414 = vmatprep.mubr.f32.mxu0 %v2730_v8  ;;  %1538 = vmatpush2.msra.mxu1 %v758_v34  ;;  %v2359_v8 = vld [vmem:[%s2697_s11 + $0x10] sm:$0xff] }
 0x140   : > { %1539 = vmatprep.mubr.f32.mxu1 %v2733_v10  ;;  %1415 = vmatmul.mubr.f32.vlgmr.msra.gmra.mxu0 %v2357_v42  ;;  %v2360_v10 = vld [vmem:[%s2697_s11 + $0x18] sm:$0xff] }
 0x141   : > { %1540 = vmatmul.mubr.f32.vlgmr.msra.gmra.mxu1 %v2736_v11  ;;  %1420 = vmatprep.mubr.f32.mxu0 %v2749_v22  ;;  %v2361_v11 = vld [vmem:[%s2697_s11 + $0x20] sm:$0xff] }
 0x142   : > { %1545 = vmatprep.mubr.f32.mxu1 %v2752_v23  ;;  %v2362_v22 = vld [vmem:[%s2704_s26] sm:$0xff]  ;;  %v2363_v23 = vld [vmem:[%s2704_s26 + $0x8] sm:$0xff] }
 0x144   : > { %1421 = vmatmul.mubr.f32.gmra.mxu0 %v2358_v43 }
 0x145   : > { %1546 = vmatmul.mubr.f32.gmra.mxu1 %v2755_v26  ;;  %1426 = vmatprep.mubr.f32.mxu0 %v2768_v37 }
 0x146   : > { %1551 = vmatprep.mubr.f32.mxu1 %v2771_v38 }
 0x148   : > { %1427 = vmatmul.mubr.f32.gmra.mxu0 %v2359_v8 }
 0x149   : > { %1552 = vmatmul.mubr.f32.gmra.mxu1 %v2774_v41  ;;  %1432 = vmatprep.mubr.f32.mxu0 %v2785_v54 }
 0x14a   : > { %1557 = vmatprep.mubr.f32.mxu1 %v2788_v55 }
 0x14c   : > { %1433 = vmatmul.mubr.f32.gmra.mxu0 %v2360_v10 }
 0x14d   : > { %1558 = vmatmul.mubr.f32.gmra.mxu1 %v2791_v58  ;;  %1438 = vmatprep.mubr.f32.mxu0 %v2804_v7  ;;  %v2364_v58 = vld [vmem:[%s2704_s26 + $0x10] sm:$0xff] }
 0x14e   : > { %1563 = vmatprep.mubr.f32.mxu1 %v2807_v9 }
 0x150   : > { %1439 = vmatmul.mubr.f32.gmra.mxu0 %v2361_v11 }
 0x151   : > { %1564 = vmatmul.mubr.f32.gmra.mxu1 %v2810_v14  ;;  %1444 = vmatprep.mubr.f32.mxu0 %v2823_v31  ;;  %v2365_v31 = vld [vmem:[%s2704_s26 + $0x18] sm:$0xff] }
 0x152   : > { %1569 = vmatprep.mubr.f32.mxu1 %v2826_v32 }
 0x154   : > { %1445 = vmatmul.mubr.f32.gmra.mxu0 %v2362_v22 }
 0x155   : > { %1570 = vmatmul.mubr.f32.gmra.mxu1 %v2829_v35  ;;  %1450 = vmatprep.mubr.f32.mxu0 %v2845_v62 }
 0x156   : > { %1575 = vmatprep.mubr.f32.mxu1 %v2848_v63  ;;  %v2366_v63 = vld [vmem:[%s2704_s26 + $0x20] sm:$0xff] }
 0x158   : > { %1451 = vmatmul.mubr.f32.gmra.mxu0 %v2363_v23  ;;  %v916_v26 = vpop.f32.mrf.mxu0 }
 0x159   : > { %1576 = vmatmul.mubr.f32.gmra.mxu1 %v2851_v2  ;;  %v1041_v37 = vpop.f32.mrf.mxu1  ;;  %1456 = vmatprep.mubr.f32.mxu0 %v2864_v25 }
 0x15a   : > { %1581 = vmatprep.mubr.f32.mxu1 %v2867_v27  ;;  %v2976_v38 = vadd.f32 %v1041_v37, %v916_v26  ;;  %v918_v41 = vpop.f32.mrf.mxu0 }
 0x15b   : > { %v1043_v54 = vpop.f32.mrf.mxu1 }
 0x15c   : > { %v2978_v55 = vadd.f32 %v1043_v54, %v918_v41  ;;  %1457 = vmatmul.mubr.f32.gmra.mxu0 %v2364_v58 }
 0x15d   : > { %1582 = vmatmul.mubr.f32.gmra.mxu1 %v2870_v30  ;;  %1462 = vmatprep.mubr.f32.mxu0 %v2881_v49 }
 0x15e   : > { %1587 = vmatprep.mubr.f32.mxu1 %v2884_v52  ;;  %v922_v7 = vpop.f32.mrf.mxu0 }
 0x15f   : > { %v1047_v9 = vpop.f32.mrf.mxu1 }
 0x160   : > { %v2984_v14 = vadd.f32 %v1047_v9, %v922_v7  ;;  %1463 = vmatmul.mubr.f32.gmra.mxu0 %v2365_v31  ;;  %v924_v32 = vpop.f32.mrf.mxu0 }
 0x161   : > { %1588 = vmatmul.mubr.f32.gmra.mxu1 %v2887_v57  ;;  %v1049_v35 = vpop.f32.mrf.mxu1  ;;  %1468 = vmatprep.mubr.f32.mxu0 %v2894_v17 }
 0x162   : > { %1593 = vmatprep.mubr.f32.mxu1 %v2897_v18  ;;  %v2990_v62 = vadd.f32 %v1049_v35, %v924_v32 }
 0x164   : > { %1469 = vmatmul.mubr.f32.gmra.mxu0 %v2366_v63  ;;  %v928_v2 = vpop.f32.mrf.mxu0 }
 0x165   : > { %1594 = vmatmul.mubr.f32.gmra.mxu1 %v2900_v28  ;;  %v1053_v25 = vpop.f32.mrf.mxu1 }
 0x166   : > { %v2994_v27 = vadd.f32 %v1053_v25, %v928_v2  ;;  %v930_v30 = vpop.f32.mrf.mxu0 }
 0x167   : > { %v1055_v49 = vpop.f32.mrf.mxu1 }
 0x168   : > { %v2996_v52 = vadd.f32 %v1055_v49, %v930_v30 }
 0x16a   : > { %v934_v57 = vpop.f32.mrf.mxu0 }
 0x16b   : > { %v1059_v44 = vpop.f32.mrf.mxu1 }
 0x16c   : > { %v2998_v45 = vadd.f32 %v1059_v44, %v934_v57  ;;  %v936_v17 = vpop.f32.mrf.mxu0 }
 0x16d   : > { %v1061_v18 = vpop.f32.mrf.mxu1 }
 0x16e   : > { %v3000_v46 = vadd.f32 %v1061_v18, %v936_v17 }
 0x170   : > { %v940_v21 = vpop.f32.mrf.mxu0 }
 0x171   : > { %v1065_v39 = vpop.f32.mrf.mxu1 }
 0x172   : > { %v3002_v47 = vadd.f32 %v1065_v39, %v940_v21  ;;  %v942_v28 = vpop.f32.mrf.mxu0 }
 0x173   : > { %v1067_v48 = vpop.f32.mrf.mxu1 }
 0x174   : > { %v3004_v53 = vadd.f32 %v1067_v48, %v942_v28 }
 0x176   : > { %v946_v50 = vpop.f32.mrf.mxu0 }
 0x177   : > { %v1071_v56 = vpop.f32.mrf.mxu1 }
 0x178   : > { %v3006_v59 = vadd.f32 %v1071_v56, %v946_v50  ;;  %v948_v60 = vpop.f32.mrf.mxu0 }
 0x179   : > { %v1073_v61 = vpop.f32.mrf.mxu1 }
 0x17a   : > { %v3010_v36 = vsub.f32 %v2976_v38, %v3006_v59  ;;  %v3012_v0 = vadd.f32 %v1073_v61, %v948_v60 }
 0x17c   : > { %v3016_v1 = vsub.f32 %v2978_v55, %v3012_v0 }
 0x17f   : > { %v952_v3 = vpop.f32.mrf.mxu0 }
 0x180   : > { %v1077_v12 = vpop.f32.mrf.mxu1 }
 0x181   : > { %v3018_v51 = vadd.f32 %v1077_v12, %v952_v3  ;;  %v954_v13 = vpop.f32.mrf.mxu0 }
 0x182   : > { %v1079_v15 = vpop.f32.mrf.mxu1 }
 0x183   : > { %v3022_v4 = vsub.f32 %v2984_v14, %v3018_v51  ;;  %v3024_v16 = vadd.f32 %v1079_v15, %v954_v13 }
 0x185   : > { %v3028_v24 = vsub.f32 %v2990_v62, %v3024_v16  ;;  %v958_v19 = vpop.f32.mrf.mxu0 }
 0x186   : > { %v1083_v20 = vpop.f32.mrf.mxu1 }
 0x187   : > { %v3030_v29 = vadd.f32 %v1083_v20, %v958_v19  ;;  %v960_v40 = vpop.f32.mrf.mxu0 }
 0x188   : > { %v1085_v6 = vpop.f32.mrf.mxu1 }
 0x189   : > { %v3034_v33 = vsub.f32 %v2994_v27, %v3030_v29  ;;  %v3036_v5 = vadd.f32 %v1085_v6, %v960_v40 }
 0x18b   : > { %v3040_v34 = vsub.f32 %v2996_v52, %v3036_v5  ;;  %v964_v42 = vpop.f32.mrf.mxu0 }
 0x18c   : > { %v1089_v43 = vpop.f32.mrf.mxu1 }
 0x18d   : > { %v3042_v8 = vadd.f32 %v1089_v43, %v964_v42  ;;  %v966_v10 = vpop.f32.mrf.mxu0 }
 0x18e   : > { %v1091_v11 = vpop.f32.mrf.mxu1 }
 0x18f   : > { %v3046_v22 = vsub.f32 %v2998_v45, %v3042_v8  ;;  %v3048_v23 = vadd.f32 %v1091_v11, %v966_v10  ;;  %v1715_v11 = vmul.f32 %v3006_v59, %v3006_v59 }
 0x191   : > { %v3052_v26 = vsub.f32 %v3000_v46, %v3048_v23  ;;  %v970_v37 = vpop.f32.mrf.mxu0 }
 0x192   : > { %v1095_v41 = vpop.f32.mrf.mxu1 }
 0x193   : > { %v3054_v54 = vadd.f32 %v1095_v41, %v970_v37  ;;  %v972_v58 = vpop.f32.mrf.mxu0 }
 0x194   : > { %v1097_v7 = vpop.f32.mrf.mxu1 }
 0x195   : > { %v3058_v9 = vsub.f32 %v3002_v47, %v3054_v54  ;;  %v3060_v31 = vadd.f32 %v1097_v7, %v972_v58 }
 0x197   : > { %v3064_v32 = vsub.f32 %v3004_v53, %v3060_v31 }
 0x1ac   : > { %v3066_v35 = vpop.f32.mrf.mxu0 }
 0x1ad   : > { %v3068_v63 = vpop.f32.mrf.mxu1 }
 0x1ae   : > { %v1168_v2 = vpop.f32.mrf.mxu0 }
 0x1af   : > { %v1293_v25 = vpop.f32.mrf.mxu1 }
 0x1b0   : > { %v3106_v59 = vadd.f32 %v1293_v25, %v1168_v2  ;;  %v1670_v2 = vmul.f32 %v2976_v38, %v2976_v38  ;;  %v1721_v25 = vmul.f32 %v3030_v29, %v3030_v29  ;;  %v1673_v29 = vmul.f32 %v2984_v14, %v2984_v14 }
 0x1b2   : > { %v1172_v30 = vpop.f32.mrf.mxu0 }
 0x1b3   : > { %v1297_v49 = vpop.f32.mrf.mxu1 }
 0x1b4   : > { %v3070_v57 = vadd.f32 %v1297_v49, %v1172_v30  ;;  %v1174_v44 = vpop.f32.mrf.mxu0 }
 0x1b5   : > { %v1299_v17 = vpop.f32.mrf.mxu1 }
 0x1b8   : > { %v1178_v18 = vpop.f32.mrf.mxu0 }
 0x1b9   : > { %v1303_v21 = vpop.f32.mrf.mxu1 }
 0x1ba   : > { %v3072_v39 = vadd.f32 %v1303_v21, %v1178_v18  ;;  %v1180_v28 = vpop.f32.mrf.mxu0 }
 0x1bb   : > { %v1305_v48 = vpop.f32.mrf.mxu1 }
 0x1be   : > { %v1184_v50 = vpop.f32.mrf.mxu0 }
 0x1bf   : > { %v1309_v56 = vpop.f32.mrf.mxu1 }
 0x1c0   : > { %v3074_v60 = vadd.f32 %v1309_v56, %v1184_v50  ;;  %v3076_v61 = vpop.f32.mrf.mxu0  ;;  %v1718_v50 = vmul.f32 %v3018_v51, %v3018_v51  ;;  %v3116_v51 = vadd.f32 %v1299_v17, %v1174_v44 }
 0x1c1   : > { %v3078_v3 = vpop.f32.mrf.mxu1 }
 0x1c2   : > { %v1688_v17 = vmul.f32 %v3116_v51, %v3116_v51 }
 0x1c4   : > { %v1190_v12 = vpop.f32.mrf.mxu0 }
 0x1c5   : > { %v1315_v13 = vpop.f32.mrf.mxu1 }
 0x1c6   : > { %v3080_v15 = vadd.f32 %v1315_v13, %v1190_v12  ;;  %v3082_v19 = vpop.f32.mrf.mxu0 }
 0x1c7   : > { %v3084_v20 = vpop.f32.mrf.mxu1 }
 0x1ca   : > { %v3086_v40 = vpop.f32.mrf.mxu0 }
 0x1cb   : > { %v3088_v6 = vpop.f32.mrf.mxu1 }
 0x1cc   : > { %v1198_v42 = vpop.f32.mrf.mxu0 }
 0x1cd   : > { %v1323_v43 = vpop.f32.mrf.mxu1 }
 0x1ce   : > { %v3090_v10 = vadd.f32 %v1323_v43, %v1198_v42 }
 0x1d0   : > { %v1730_v37 = vmul.f32 %v3090_v10, %v3090_v10  ;;  %v3096_v41 = vpop.f32.mrf.mxu0 }
 0x1d1   : > { %v3098_v58 = vpop.f32.mrf.mxu1 }
 0x1d2   : > { %v1745_v7 = vadd.f32 %v1730_v37, %v1715_v11  ;;  %v1204_v30 = vpop.f32.mrf.mxu0 }
 0x1d3   : > { %v1329_v49 = vpop.f32.mrf.mxu1 }
 0x1d4   : > { %v3100_v18 = vadd.f32 %v1329_v49, %v1204_v30  ;;  %v1896_v21 = vadd.f32 1e-14, %v1745_v7  ;;  %v1685_v7 = vmul.f32 %v3106_v59, %v3106_v59 }
 0x1d6   : > { %v1733_v56 = vmul.f32 %v3100_v18, %v3100_v18  ;;  %2297 = vrcp.f32 %v1896_v21  ;;  %v3108_v12 = vpop.f32.mrf.mxu0 }
 0x1d7   : > { %v3110_v13 = vpop.f32.mrf.mxu1 }
 0x1d8   : > { %3586 = vst [vmem:[#allocation18_spill] sm:$0xff] %v3110_v13  ;;  %v1748_v42 = vadd.f32 %v1733_v56, %v1718_v50  ;;  %v1210_v43 = vpop.f32.mrf.mxu0  ;;  %v3128_v56 = vadd.f32 %v1685_v7, %v1670_v2  ;;  %v3141_v2 = vadd.f32 %v1305_v48, %v1180_v28  ;;  %v3158_v48 = vadd.f32 %v3078_v3, %v3076_v61 }
 0x1d9   : > { %v1335_v11 = vpop.f32.mrf.mxu1 }
 0x1da   : > { %v1899_v37 = vadd.f32 1e-14, %v1748_v42  ;;  %v3114_v30 = vadd.f32 %v1335_v11, %v1210_v43  ;;  %v1881_v7 = vadd.f32 1e-14, %v3128_v56  ;;  %v1694_v61 = vmul.f32 %v3158_v48, %v3158_v48 }
 0x1dc   : > { %3587 = vst [vmem:[#allocation19_spill] sm:$0xff] %v3114_v30  ;;  %2299 = vrcp.f32 %v1899_v37  ;;  %v1736_v49 = vmul.f32 %v3114_v30, %v3114_v30  ;;  %v3124_v21 = vpop.f32.mrf.mxu0  ;;  %v1724_v37 = vmul.f32 %v3042_v8, %v3042_v8 }
 0x1dd   : > { %3588 = vst [vmem:[#allocation20_spill] sm:$0xff] %v3124_v21  ;;  %v3126_v50 = vpop.f32.mrf.mxu1 }
 0x1de   : > { %3589 = vst [vmem:[#allocation21_spill] sm:$0xff] %v3126_v50  ;;  %v1751_v42 = vadd.f32 %v1736_v49, %v1721_v25  ;;  %v1216_v43 = vpop.f32.mrf.mxu0 }
 0x1df   : > { %v1341_v44 = vpop.f32.mrf.mxu1 }
 0x1e0   : > { %v3132_v11 = vadd.f32 %v1341_v44, %v1216_v43  ;;  %v1902_v38 = vadd.f32 1e-14, %v1751_v42  ;;  %v3147_v42 = vadd.f32 %v1688_v17, %v1673_v29 }
 0x1e2   : > { %3590 = vst [vmem:[#allocation22_spill] sm:$0xff] %v3132_v11  ;;  %v1739_v50 = vmul.f32 %v3132_v11, %v3132_v11  ;;  %2301 = vrcp.f32 %v1902_v38  ;;  %v3143_v25 = vpop.f32.mrf.mxu0  ;;  %v1691_v11 = vmul.f32 %v3141_v2, %v3141_v2  ;;  %v1884_v28 = vadd.f32 1e-14, %v3147_v42 }
 0x1e3   : > { %v3145_v49 = vpop.f32.mrf.mxu1  ;;  %v2298_v43 = vpop.eup %2297  ;;  %v1727_v38 = vmul.f32 %v3054_v54, %v3054_v54  ;;  %v3177_v54 = vadd.f32 %v3084_v20, %v3082_v19 }
 0x1e4   : > { %v1754_v44 = vadd.f32 %v1739_v50, %v1724_v37  ;;  %v3149_v14 = vmul.f32 %v2298_v43, %v1881_v7  ;;  %v1222_v21 = vpop.f32.mrf.mxu0  ;;  %v1676_v50 = vmul.f32 %v2994_v27, %v2994_v27  ;;  %v3570_v43 = vlaneseq }
 0x1e5   : > { %v1347_v8 = vpop.f32.mrf.mxu1 }
 0x1e6   : > { %v1905_v30 = vadd.f32 1e-14, %v1754_v44  ;;  %v3153_v13 = vadd.f32 %v1347_v8, %v1222_v21  ;;  %v3168_v21 = vadd.f32 %v1691_v11, %v1676_v50 }
 0x1e8   : > { %2303 = vrcp.f32 %v1905_v30  ;;  %v1742_v29 = vmul.f32 %v3153_v13, %v3153_v13  ;;  %v1679_v30 = vmul.f32 %v2998_v45, %v2998_v45  ;;  %v1887_v27 = vadd.f32 1e-14, %v3168_v21 }
 0x1e9   : > { %v2300_v17 = vpop.eup %2299 }
 0x1ea   : > { %v3166_v37 = vmul.f32 %v2300_v17, %v1884_v28  ;;  %v1757_v7 = vadd.f32 %v1742_v29, %v1727_v38  ;;  %v3179_v8 = vadd.f32 %v1694_v61, %v1679_v30  ;;  %v1601_v28 = vshrl.u32 %v3570_v43, 7 }
 0x1eb   : > { %v1697_v17 = vmul.f32 %v3177_v54, %v3177_v54  ;;  %v1682_v38 = vmul.f32 %v3002_v47, %v3002_v47  ;;  %v3571_v30 = vmov 0.0   ;;  %v3200_v43 = vmul.f32 %v2990_v62, %v2990_v62 }
 0x1ec   : > { %v1908_v3 = vadd.f32 1e-14, %v1757_v7  ;;  %v1890_v45 = vadd.f32 1e-14, %v3179_v8  ;;  %v1605_v20 = vadd.s32 32, %v1601_v28  ;;  %v3204_v47 = vmul.f32 %v2996_v52, %v2996_v52 }
 0x1ed   : > { %v1712_v29 = vadd.f32 %v1697_v17, %v1682_v38  ;;  %v3208_v28 = vmul.f32 %v3000_v46, %v3000_v46  ;;  %v3212_v17 = vmul.f32 %v3004_v53, %v3004_v53  ;;  %v3224_v62 = vmul.f32 %v3016_v1, %v3016_v1 }
 0x1ee   : > { %2305 = vrcp.f32 %v1908_v3  ;;  %vm1616_vm3 = vcmp.lt.s32.totalorder %v1605_v20, 33  ;;  %v3228_v52 = vmul.f32 %v3022_v4, %v3022_v4  ;;  %v3232_v46 = vmul.f32 %v3024_v16, %v3024_v16 }
 0x1ef   : > { %v2302_v44 = vpop.eup %2301  ;;  %v1893_v7 = vadd.f32 1e-14, %v1712_v29  ;;  %v3236_v53 = vmul.f32 %v3028_v24, %v3028_v24  ;;  %v3242_v1 = vmul.f32 %v3034_v33, %v3034_v33  ;;  %v3246_v4 = vmul.f32 %v3036_v5, %v3036_v5 }
 0x1f0   : > { %v3181_v11 = vmul.f32 %v2302_v44, %v1887_v27  ;;  %v3194_v27 = vsel %vm1616_vm3, 1.0, %v3571_v30  ;;  %v1671_v44 = vmul.f32 %v2978_v55, %v2978_v55  ;;  %v3220_v55 = vmul.f32 %v3012_v0, %v3012_v0 }
 0x1f1   : > { %v1322_v16 = vadd.f32 %v3088_v6, %v3086_v40  ;;  %v3254_v24 = vmul.f32 %v3040_v34, %v3040_v34  ;;  %v3262_v33 = vmul.f32 %v3048_v23, %v3048_v23  ;;  %v3266_v5 = vmul.f32 %v3052_v26, %v3052_v26 }
 0x1f2   : > { %3591 = vst [vmem:[#allocation23_spill] sm:$0xff] %v3181_v11  ;;  %v3270_v6 = vmul.f32 %v3058_v9, %v3058_v9  ;;  %v3274_v34 = vmul.f32 %v3060_v31, %v3060_v31  ;;  %v3282_v23 = vmul.f32 %v3064_v32, %v3064_v32  ;;  %v1655_v9 = vsub.f32 %v3106_v59, %v3090_v10 }
 0x1f3   : > { %3594 = vst [vmem:[#allocation26_spill] sm:$0xff] %v3254_v24  ;;  %3595 = vst [vmem:[#allocation27_spill] sm:$0xff] %v3262_v33  ;;  %v3296_v32 = vmul.f32 %v3072_v39, %v3072_v39  ;;  %v3300_v30 = vmul.f32 %v3074_v60, %v3074_v60  ;;  %v3304_v10 = vmul.f32 %v3080_v15, %v3080_v15  ;;  %v3603_v24 = vld [vmem:[#allocation21_spill] sm:$0xff]  ;;  %2307 = vlog2.f32 %v3149_v14 }
 0x1f4   : > { %3596 = vst [vmem:[#allocation28_spill] sm:$0xff] %v3266_v5  ;;  %3597 = vst [vmem:[#allocation29_spill] sm:$0xff] %v3274_v34  ;;  %v1328_v59 = vadd.f32 %v3098_v58, %v3096_v41  ;;  %v1775_v11 = vmul.f32 %v1655_v9, %v1655_v9  ;;  %2309 = vlog2.f32 %v3166_v37 }
 0x1f5   : > { %v2304_v50 = vpop.eup %2303  ;;  %3598 = vst [vmem:[#allocation30_spill] sm:$0xff] %v3282_v23  ;;  %v3600_v23 = vld [vmem:[#allocation18_spill] sm:$0xff] }
 0x1f6   : > { %v3189_v19 = vmul.f32 %v2304_v50, %v1890_v45  ;;  %v3216_v45 = vmul.f32 %v3010_v36, %v3010_v36  ;;  %v1292_v36 = vadd.f32 %v3068_v63, %v3066_v35  ;;  %v3258_v35 = vmul.f32 %v3046_v22, %v3046_v22 }
 0x1f7   : > { %v1334_v41 = vadd.f32 %v3600_v23, %v3108_v12 }
 0x1f8   : > { %3592 = vst [vmem:[#allocation24_spill] sm:$0xff] %v3189_v19  ;;  %v1672_v26 = vmul.f32 %v1292_v36, %v1292_v36  ;;  %v1642_v31 = vsub.f32 %v1292_v36, %v1322_v16  ;;  %v3317_v19 = vmul.f32 %v3194_v27, %v1712_v29  ;;  %v3601_v29 = vld [vmem:[#allocation19_spill] sm:$0xff] }
 0x1f9   : > { %v1661_v9 = vsub.f32 %v3141_v2, %v3601_v29  ;;  %v3346_v2 = vmul.f32 %v1328_v59, %v1328_v59 }
 0x1fa   : > { %3599 = vst [vmem:[#allocation31_spill] sm:$0xff] %v3317_v19  ;;  %v3602_v19 = vld [vmem:[#allocation20_spill] sm:$0xff] }
 0x1fb   : > { %v2306_v61 = vpop.eup %2305  ;;  %v1340_v12 = vadd.f32 %v3603_v24, %v3602_v19  ;;  %v1648_v19 = vsub.f32 %v3072_v39, %v1334_v41  ;;  %v3604_v24 = vld [vmem:[#allocation22_spill] sm:$0xff] }
 0x1fc   : > { %v3191_v3 = vmul.f32 %v2306_v61, %v1893_v7  ;;  %v1675_v7 = vmul.f32 %v3070_v57, %v3070_v57 }
 0x1fd   : > { %v1651_v39 = vsub.f32 %v3074_v60, %v1340_v12 }
 0x1fe   : > { %3593 = vst [vmem:[#allocation25_spill] sm:$0xff] %v3191_v3 }
 0x200   : > { %v1416_v0 = vpop.f32.mrf.mxu0 }
 0x201   : > { %v1541_v50 = vpop.f32.mrf.mxu1 }
 0x202   : > { %v3250_v38 = vadd.f32 %v1541_v50, %v1416_v0  ;;  %v1418_v63 = vpop.f32.mrf.mxu0 }
 0x203   : > { %v1543_v40 = vpop.f32.mrf.mxu1 }
 0x204   : > { %v1686_v22 = vmul.f32 %v3250_v38, %v3250_v38  ;;  %v3278_v20 = vadd.f32 %v1543_v40, %v1418_v63  ;;  %v1422_v61 = vpop.f32.mrf.mxu0 }
 0x205   : > { %v1547_v0 = vpop.f32.mrf.mxu1 }
 0x206   : > { %v3288_v50 = vadd.f32 %v1686_v22, %v1671_v44  ;;  %v1687_v63 = vmul.f32 %v3278_v20, %v3278_v20  ;;  %v3292_v40 = vadd.f32 %v1547_v0, %v1422_v61  ;;  %v1424_v44 = vpop.f32.mrf.mxu0  ;;  %v1658_v22 = vsub.f32 %v3116_v51, %v3100_v18 }
 0x207   : > { %v1549_v36 = vpop.f32.mrf.mxu1  ;;  %v3323_v18 = vmul.f32 %v1322_v16, %v1322_v16  ;;  %v3325_v51 = vmul.f32 %v1642_v31, %v1642_v31 }
 0x208   : > { %v1858_v61 = vadd.f32 %v3288_v50, %v3128_v56  ;;  %v3312_v0 = vadd.f32 %v1687_v63, %v1672_v26  ;;  %v1689_v3 = vmul.f32 %v3292_v40, %v3292_v40  ;;  %v3321_v58 = vadd.f32 %v1549_v36, %v1424_v44  ;;  %v1428_v5 = vpop.f32.mrf.mxu0 }
 0x209   : > { %v1553_v34 = vpop.f32.mrf.mxu1  ;;  %v1645_v63 = vsub.f32 %v3070_v57, %v1328_v59  ;;  %v1778_v36 = vmul.f32 %v1658_v22, %v1658_v22  ;;  %v3344_v57 = vadd.f32 %v1775_v11, %v3216_v45  ;;  %v1781_v59 = vmul.f32 %v1661_v9, %v1661_v9 }
 0x20a   : > { %v1859_v56 = vadd.f32 %v1858_v61, %v3312_v0  ;;  %v3328_v26 = vadd.f32 %v1553_v34, %v1428_v5  ;;  %v1690_v23 = vmul.f32 %v3321_v58, %v3321_v58  ;;  %v1430_v44 = vpop.f32.mrf.mxu0  ;;  %v3338_v31 = vadd.f32 %v1689_v3, %v3200_v43 }
 0x20b   : > { %v1555_v16 = vpop.f32.mrf.mxu1  ;;  %v1664_v61 = vsub.f32 %v3158_v48, %v3604_v24  ;;  %v1346_v43 = vadd.f32 %v3145_v49, %v3143_v25  ;;  %v3358_v45 = vmul.f32 %v1645_v63, %v1645_v63  ;;  %v1667_v48 = vsub.f32 %v3177_v54, %v3153_v13 }
 0x20c   : > { %v1860_v5 = vadd.f32 %v1859_v56, %v3147_v42  ;;  %v3341_v34 = vadd.f32 %v1555_v16, %v1430_v44  ;;  %v1434_v29 = vpop.f32.mrf.mxu0  ;;  %v3354_v42 = vadd.f32 %v1690_v23, %v1675_v7  ;;  %v1692_v11 = vmul.f32 %v3328_v26, %v3328_v26 }
 0x20d   : > { %v1559_v33 = vpop.f32.mrf.mxu1  ;;  %v3364_v44 = vadd.f32 %v1778_v36, %v3228_v52  ;;  %v3371_v63 = vmul.f32 %v1334_v41, %v1334_v41  ;;  %v3373_v9 = vmul.f32 %v1648_v19, %v1648_v19  ;;  %v1784_v60 = vmul.f32 %v1664_v61, %v1664_v61 }
 0x20e   : > { %v1861_v3 = vadd.f32 %v1860_v5, %v3338_v31  ;;  %v1436_v22 = vpop.f32.mrf.mxu0  ;;  %v1693_v49 = vmul.f32 %v3341_v34, %v3341_v34  ;;  %v3369_v7 = vadd.f32 %v1559_v33, %v1434_v29  ;;  %v1654_v16 = vsub.f32 %v3080_v15, %v1346_v43 }
 0x20f   : > { %v1561_v56 = vpop.f32.mrf.mxu1  ;;  %v3379_v52 = vadd.f32 %v1692_v11, %v3204_v47  ;;  %v3385_v33 = vadd.f32 %v1781_v59, %v3242_v1  ;;  %v3387_v41 = vmul.f32 %v1340_v12, %v1340_v12  ;;  %v3389_v19 = vmul.f32 %v1651_v39, %v1651_v39 }
 0x210   : > { %v1862_v25 = vadd.f32 %v1861_v3, %v3354_v42  ;;  %v3375_v23 = vadd.f32 %v1561_v56, %v1436_v22  ;;  %v1440_v13 = vpop.f32.mrf.mxu0  ;;  %v1787_v24 = vmul.f32 %v1667_v48, %v1667_v48  ;;  %v3393_v15 = vadd.f32 %v1693_v49, %v3296_v32 }
 0x211   : > { %v1565_v54 = vpop.f32.mrf.mxu1  ;;  %v3401_v1 = vadd.f32 %v1784_v60, %v3258_v35  ;;  %v3403_v12 = vmul.f32 %v1346_v43, %v1346_v43  ;;  %v3407_v48 = vmul.f32 %v1654_v16, %v1654_v16  ;;  %v3417_v35 = vadd.f32 1e-14, %v3288_v50 }
 0x212   : > { %v1863_v36 = vadd.f32 %v1862_v25, %v3168_v21  ;;  %v3382_v5 = vadd.f32 %v1565_v54, %v1440_v13  ;;  %v1442_v61 = vpop.f32.mrf.mxu0  ;;  %v1695_v21 = vmul.f32 %v3369_v7, %v3369_v7  ;;  %v1696_v11 = vmul.f32 %v3375_v23, %v3375_v23 }
 0x213   : > { %v1567_v29 = vpop.f32.mrf.mxu1  ;;  %v3414_v14 = vadd.f32 %v1787_v24, %v3270_v6  ;;  %v3422_v60 = vadd.f32 1e-14, %v3312_v0  ;;  %v3430_v6 = vadd.f32 1e-14, %v3338_v31 }
 0x214   : > { %v1864_v3 = vadd.f32 %v1863_v36, %v3379_v52  ;;  %v3397_v47 = vadd.f32 %v1567_v29, %v1442_v61  ;;  %v1446_v59 = vpop.f32.mrf.mxu0  ;;  %v1698_v22 = vmul.f32 %v3382_v5, %v3382_v5  ;;  %v3425_v13 = vadd.f32 %v1695_v21, %v3208_v28 }
 0x215   : > { %v1571_v39 = vpop.f32.mrf.mxu1  ;;  %v3433_v50 = vadd.f32 %v1696_v11, %v3300_v30 }
 0x216   : > { %v1865_v32 = vadd.f32 %v1864_v3, %v3393_v15  ;;  %v1572_v56 = vadd.f32 %v1571_v39, %v1446_v59  ;;  %v1699_v43 = vmul.f32 %v3397_v47, %v3397_v47  ;;  %v1448_v25 = vpop.f32.mrf.mxu0  ;;  %v3437_v29 = vadd.f32 %v1698_v22, %v3212_v17 }
 0x217   : > { %v1573_v49 = vpop.f32.mrf.mxu1 }
 0x218   : > { %v1866_v54 = vadd.f32 %v1865_v32, %v3179_v8  ;;  %v1656_v37 = vsub.f32 %v3250_v38, %v1572_v56  ;;  %v1731_v16 = vmul.f32 %v1572_v56, %v1572_v56  ;;  %v1574_v36 = vadd.f32 %v1573_v49, %v1448_v25  ;;  %v1452_v24 = vpop.f32.mrf.mxu0 }
 0x219   : > { %v1577_v61 = vpop.f32.mrf.mxu1  ;;  %v3440_v8 = vadd.f32 %v1699_v43, %v3304_v10 }
 0x21a   : > { %v1867_v0 = vadd.f32 %v1866_v54, %v3425_v13  ;;  %v1776_v28 = vmul.f32 %v1656_v37, %v1656_v37  ;;  %v1578_v3 = vadd.f32 %v1577_v61, %v1452_v24  ;;  %v1746_v38 = vadd.f32 %v1731_v16, %v3220_v55  ;;  %v1454_v21 = vpop.f32.mrf.mxu0 }
 0x21b   : > { %v1657_v31 = vsub.f32 %v3278_v20, %v1574_v36  ;;  %v1732_v30 = vmul.f32 %v1574_v36, %v1574_v36  ;;  %v1579_v11 = vpop.f32.mrf.mxu1 }
 0x21c   : > { %v3445_v59 = vadd.f32 %v1867_v0, %v3433_v50  ;;  %v1791_v39 = vadd.f32 %v1776_v28, %v3224_v62  ;;  %v1659_v17 = vsub.f32 %v3292_v40, %v1578_v3  ;;  %v1734_v32 = vmul.f32 %v1578_v3, %v1578_v3  ;;  %v1458_v25 = vpop.f32.mrf.mxu0 }
 0x21d   : > { %v1897_v22 = vadd.f32 1e-14, %v1746_v38  ;;  %v1747_v56 = vadd.f32 %v1732_v30, %v3323_v18  ;;  %v1777_v10 = vmul.f32 %v1657_v31, %v1657_v31  ;;  %v1580_v43 = vadd.f32 %v1579_v11, %v1454_v21  ;;  %v1583_v55 = vpop.f32.mrf.mxu1 }
 0x21e   : > { %v1820_v20 = vadd.f32 %v1791_v39, %v3344_v57  ;;  %v1749_v49 = vadd.f32 %v1734_v32, %v3232_v46  ;;  %v1779_v54 = vmul.f32 %v1659_v17, %v1659_v17  ;;  %v1584_v37 = vadd.f32 %v1583_v55, %v1458_v25  ;;  %v1460_v36 = vpop.f32.mrf.mxu0 }
 0x21f   : > { %2311 = vrcp.f32 %v1897_v22  ;;  %v1792_v16 = vadd.f32 %v1777_v10, %v3325_v51  ;;  %v1898_v62 = vadd.f32 1e-14, %v1747_v56  ;;  %v1660_v40 = vsub.f32 %v3321_v58, %v1580_v43  ;;  %v1585_v24 = vpop.f32.mrf.mxu1  ;;  %v3459_v51 = vpop.eup %2307 }
 0x220   : > { %v1900_v61 = vadd.f32 1e-14, %v1749_v49  ;;  %v1735_v18 = vmul.f32 %v1580_v43, %v1580_v43  ;;  %v1662_v0 = vsub.f32 %v3328_v26, %v1584_v37  ;;  %v3457_v28 = vmul.f32 %v3194_v27, %v3437_v29  ;;  %v1464_v38 = vpop.f32.mrf.mxu0  ;;  %v3465_v56 = vpop.eup %2309 }
 0x221   : > { %v1821_v57 = vadd.f32 %v1820_v20, %v1792_v16  ;;  %2313 = vrcp.f32 %v1898_v62  ;;  %v1780_v46 = vmul.f32 %v1660_v40, %v1660_v40  ;;  %v1737_v3 = vmul.f32 %v1584_v37, %v1584_v37  ;;  %v1589_v31 = vpop.f32.mrf.mxu1  ;;  %v3605_v40 = vld [vmem:[#allocation27_spill] sm:$0xff] }
 0x222   : > { %v1794_v58 = vadd.f32 %v1779_v54, %v3236_v53  ;;  %2315 = vrcp.f32 %v1900_v61  ;;  %v1750_v30 = vadd.f32 %v1735_v18, %v3346_v2  ;;  %v1586_v21 = vadd.f32 %v1585_v24, %v1460_v36  ;;  %v1466_v32 = vpop.f32.mrf.mxu0  ;;  %v3606_v61 = vld [vmem:[#allocation26_spill] sm:$0xff] }
 0x223   : > { %v1822_v26 = vadd.f32 %v1821_v57, %v3364_v44  ;;  %v1752_v11 = vadd.f32 %v1737_v3, %v3246_v4  ;;  %v1782_v39 = vmul.f32 %v1662_v0, %v1662_v0  ;;  %v1590_v17 = vadd.f32 %v1589_v31, %v1464_v38  ;;  %v1591_v22 = vpop.f32.mrf.mxu1 }
 0x224   : > { %v1795_v10 = vadd.f32 %v1780_v46, %v3358_v45  ;;  %v1901_v43 = vadd.f32 1e-14, %v1750_v30  ;;  %v1663_v25 = vsub.f32 %v3341_v34, %v1586_v21  ;;  %v1738_v53 = vmul.f32 %v1586_v21, %v1586_v21  ;;  %v1470_v44 = vpop.f32.mrf.mxu0 }
 0x225   : > { %v1823_v55 = vadd.f32 %v1822_v26, %v1794_v58  ;;  %v1903_v20 = vadd.f32 1e-14, %v1752_v11  ;;  %v1665_v2 = vsub.f32 %v3369_v7, %v1590_v17  ;;  %v1740_v49 = vmul.f32 %v1590_v17, %v1590_v17  ;;  %v1595_v54 = vpop.f32.mrf.mxu1 }
 0x226   : > { %2317 = vrcp.f32 %v1901_v43  ;;  %v1753_v4 = vadd.f32 %v1738_v53, %v3371_v63  ;;  %v1783_v37 = vmul.f32 %v1663_v25, %v1663_v25  ;;  %v1592_v16 = vadd.f32 %v1591_v22, %v1466_v32  ;;  %v1472_v36 = vpop.f32.mrf.mxu0  ;;  %v3607_v43 = vld [vmem:[#allocation29_spill] sm:$0xff] }
 0x227   : > { %v1824_v62 = vadd.f32 %v1823_v55, %v1795_v10  ;;  %2319 = vrcp.f32 %v1903_v20  ;;  %v1755_v45 = vadd.f32 %v1740_v49, %v3605_v40  ;;  %v1597_v24 = vpop.f32.mrf.mxu1  ;;  %v1857_v34 = vmul.f32 %v3194_v27, %v3440_v8  ;;  %v3610_v40 = vld [vmem:[#allocation30_spill] sm:$0xff] }
 0x228   : > { %v1797_v18 = vadd.f32 %v1782_v39, %v3606_v61  ;;  %v1904_v7 = vadd.f32 1e-14, %v1753_v4  ;;  %v1666_v0 = vsub.f32 %v3375_v23, %v1592_v16  ;;  %v1741_v57 = vmul.f32 %v1592_v16, %v1592_v16 }
 0x229   : > { %v1825_v46 = vadd.f32 %v1824_v62, %v3385_v33  ;;  %v1785_v63 = vmul.f32 %v1665_v2, %v1665_v2  ;;  %v1906_v3 = vadd.f32 1e-14, %v1755_v45  ;;  %v1596_v38 = vadd.f32 %v1595_v54, %v1470_v44 }
 0x22a   : > { %v1798_v31 = vadd.f32 %v1783_v37, %v3373_v9  ;;  %2321 = vrcp.f32 %v1904_v7  ;;  %v1756_v58 = vadd.f32 %v1741_v57, %v3387_v41  ;;  %v1598_v30 = vadd.f32 %v1597_v24, %v1472_v36  ;;  %v3608_v41 = vld [vmem:[#allocation28_spill] sm:$0xff] }
 0x22b   : > { %v1826_v21 = vadd.f32 %v1825_v46, %v1797_v18  ;;  %2323 = vrcp.f32 %v1906_v3  ;;  %v1668_v26 = vsub.f32 %v3382_v5, %v1596_v38  ;;  %v1743_v11 = vmul.f32 %v1596_v38, %v1596_v38  ;;  %v3609_v5 = vld [vmem:[#allocation31_spill] sm:$0xff] }
 0x22c   : > { %v2312_v39 = vpop.eup %2311  ;;  %v1786_v17 = vmul.f32 %v1666_v0, %v1666_v0  ;;  %v1907_v23 = vadd.f32 1e-14, %v1756_v58  ;;  %v1669_v32 = vsub.f32 %v3397_v47, %v1598_v30  ;;  %v1744_v33 = vmul.f32 %v1598_v30, %v1598_v30  ;;  %v3612_v46 = vld [vmem:[#allocation23_spill] sm:$0xff] }
 0x22d   : > { %v1927_v22 = vmul.f32 %v2312_v39, %v3417_v35  ;;  %v1827_v10 = vadd.f32 %v1826_v21, %v1798_v31  ;;  %v1758_v9 = vadd.f32 %v1743_v11, %v3607_v43  ;;  %v1788_v25 = vmul.f32 %v1668_v26, %v1668_v26 }
 0x22e   : > { %v2314_v53 = vpop.eup %2313  ;;  %v1800_v55 = vadd.f32 %v1785_v63, %v3608_v41  ;;  %2325 = vrcp.f32 %v1907_v23  ;;  %v1759_v20 = vadd.f32 %v1744_v33, %v3403_v12  ;;  %v1869_v2 = vadd.f32 %v3445_v59, %v3609_v5  ;;  %v3614_v23 = vld [vmem:[#allocation25_spill] sm:$0xff] }
 0x22f   : > { %v2316_v49 = vpop.eup %2315  ;;  %2327 = vlog2.f32 %v1927_v22  ;;  %v1928_v47 = vmul.f32 %v2314_v53, %v3422_v60  ;;  %v1828_v44 = vadd.f32 %v1827_v10, %v3401_v1  ;;  %v1789_v35 = vmul.f32 %v1669_v32, %v1669_v32 }
 0x230   : > { %v1930_v54 = vmul.f32 %v2316_v49, %v3430_v6  ;;  %v1801_v4 = vadd.f32 %v1786_v17, %v3389_v19  ;;  %v1909_v37 = vadd.f32 1e-14, %v1758_v9  ;;  %v1910_v16 = vadd.f32 1e-14, %v1759_v20 }
 0x231   : > { %2329 = vlog2.f32 %v1928_v47  ;;  %v1829_v62 = vadd.f32 %v1828_v44, %v1800_v55  ;;  %v1803_v12 = vadd.f32 %v1788_v25, %v3610_v40  ;;  %v1870_v45 = vadd.f32 %v1869_v2, %v3457_v28 }
 0x232   : > { %v1886_v59 = vadd.f32 1e-14, %v3354_v42  ;;  %v1888_v36 = vadd.f32 1e-14, %v3379_v52  ;;  %2331 = vlog2.f32 %v1930_v54  ;;  %v1817_v1 = vmul.f32 %v3194_v27, %v3414_v14 }
 0x233   : > { %v2318_v60 = vpop.eup %2317  ;;  %2333 = vrcp.f32 %v1909_v37  ;;  %v1804_v19 = vadd.f32 %v1789_v35, %v3407_v48  ;;  %v1830_v6 = vadd.f32 %v1829_v62, %v1801_v4  ;;  %v1871_v24 = vadd.f32 %v1870_v45, %v1857_v34 }
 0x234   : > { %v2320_v61 = vpop.eup %2319  ;;  %v1931_v18 = vmul.f32 %v2318_v60, %v1886_v59  ;;  %2335 = vrcp.f32 %v1910_v16  ;;  %v1818_v28 = vmul.f32 %v3194_v27, %v1803_v12  ;;  %v3611_v42 = vlaneseq }
 0x235   : > { %v1933_v7 = vmul.f32 %v2320_v61, %v1888_v36  ;;  %v1831_v0 = vadd.f32 %v1830_v6, %v1817_v1  ;;  %v1889_v52 = vadd.f32 1e-14, %v3393_v15  ;;  %v1891_v48 = vadd.f32 1e-14, %v3425_v13  ;;  %v3613_v13 = vld [vmem:[#allocation24_spill] sm:$0xff] }
 0x236   : > { %v3500_v57 = vand.u32 127, %v3611_v42  ;;  %2337 = vlog2.f32 %v1931_v18  ;;  %v1819_v34 = vmul.f32 %v3194_v27, %v1804_v19  ;;  %v1892_v21 = vadd.f32 1e-14, %v3433_v50 }
 0x237   : > { %v2322_v14 = vpop.eup %2321  ;;  %2339 = vlog2.f32 %v3612_v46  ;;  %v1832_v63 = vadd.f32 %v1831_v0, %v1818_v28  ;;  %v1957_v15 = vmul.f32 0.6931472, %v3459_v51  ;;  %v1894_v10 = vadd.f32 1e-14, %v3437_v29 }
 0x238   : > { %v2324_v3 = vpop.eup %2323  ;;  %v1934_v38 = vmul.f32 %v2322_v14, %v1889_v52  ;;  %v1630_v58 = vadd.s32 256, %v3500_v57  ;;  %2341 = vlog2.f32 %v1933_v7  ;;  %v1895_v9 = vadd.f32 1e-14, %v3440_v8 }
 0x239   : > { %v1833_v31 = vadd.f32 %v1832_v63, %v1819_v34  ;;  %v1936_v30 = vmul.f32 %v2324_v3, %v1891_v48  ;;  %v1986_v33 = vand.u32 2147483647, %v1957_v15  ;;  %v3615_v25 = vmov 0.0  }
 0x23a   : > { %2343 = vlog2.f32 %v1934_v38  ;;  %vm1633_vm4 = vcmp.lt.s32.totalorder %v1630_v58, 257  ;;  %v1963_v20 = vmul.f32 0.6931472, %v3465_v56  ;;  %vm2044_vm5 = vcmp.eq.s32.totalorder %v3500_v57, 1 }
 0x23b   : > { %v2326_v26 = vpop.eup %2325  ;;  %1834 = vadd.xlane.f32.xlu0 %v1833_v31  ;;  %2345 = vlog2.f32 %v3613_v13  ;;  %v2198_v53 = vsel %vm1633_vm4, 1.0, %v3615_v25  ;;  %vm2041_vm6 = vcmp.eq.s32.totalorder %v3500_v57, 0  ;;  %vm2048_vm7 = vcmp.eq.s32.totalorder %v3500_v57, 2 }
 0x23c   : > { %v2328_v11 = vpop.eup %2327  ;;  %v1937_v39 = vmul.f32 %v2326_v26, %v1892_v21  ;;  %2347 = vlog2.f32 %v3614_v23  ;;  %v1989_v4 = vand.u32 2147483647, %v1963_v20  ;;  %v1955_v23 = vmul.f32 %v2198_v53, %v3194_v27 }
 0x23d   : > { %v1959_v17 = vmul.f32 0.6931472, %v2328_v11 }
 0x23e   : > { %v2330_v32 = vpop.eup %2329  ;;  %2349 = vlog2.f32 %v1937_v39 }
 0x23f   : > { %v2332_v22 = vpop.eup %2331  ;;  %1872 = vadd.xlane.f32.xlu0 %v1871_v24  ;;  %v1961_v50 = vmul.f32 0.6931472, %v2330_v32  ;;  %2351 = vlog2.f32 %v1936_v30  ;;  %v1987_v51 = vand.u32 2147483647, %v1959_v17 }
 0x240   : > { %v2334_v43 = vpop.eup %2333  ;;  %v1965_v44 = vmul.f32 0.6931472, %v2332_v22 }
 0x241   : > { %v2336_v41 = vpop.eup %2335  ;;  %v1939_v55 = vmul.f32 %v2334_v43, %v1894_v10  ;;  %v1988_v5 = vand.u32 2147483647, %v1961_v50  ;;  %v2016_v2 = vadd.f32 %v1987_v51, %v1986_v33 }
 0x242   : > { %v1940_v49 = vmul.f32 %v2336_v41, %v1895_v9  ;;  %v1990_v12 = vand.u32 2147483647, %v1965_v44 }
 0x243   : > { %v2338_v47 = vpop.eup %2337  ;;  %2353 = vlog2.f32 %v1939_v55  ;;  %v2003_v29 = vmul.f32 %v2198_v53, %v1988_v5 }
 0x244   : > { %v2340_v35 = vpop.eup %2339  ;;  %v1967_v54 = vmul.f32 0.6931472, %v2338_v47  ;;  %2355 = vlog2.f32 %v1940_v49 }
 0x245   : > { %v2017_v37 = vadd.f32 %v2016_v2, %v2003_v29  ;;  %v2342_v16 = vpop.eup %2341  ;;  %v1969_v40 = vmul.f32 0.6931472, %v2340_v35 }
 0x246   : > { %v1991_v8 = vand.u32 2147483647, %v1967_v54  ;;  %v1971_v36 = vmul.f32 0.6931472, %v2342_v16 }
 0x247   : > { %v2344_v62 = vpop.eup %2343  ;;  %v2018_v45 = vadd.f32 %v2017_v37, %v1989_v4  ;;  %v1992_v24 = vand.u32 2147483647, %v1969_v40 }
 0x248   : > { %v1973_v59 = vmul.f32 0.6931472, %v2344_v62  ;;  %v2346_v56 = vpop.eup %2345  ;;  %v2006_v1 = vmul.f32 %v2198_v53, %v1991_v8  ;;  %v1993_v42 = vand.u32 2147483647, %v1971_v36 }
 0x249   : > { %v2019_v60 = vadd.f32 %v2018_v45, %v1990_v12  ;;  %v2348_v19 = vpop.eup %2347  ;;  %v1975_v28 = vmul.f32 0.6931472, %v2346_v56 }
 0x24a   : > { %v1994_v61 = vand.u32 2147483647, %v1973_v59  ;;  %v1981_v46 = vmul.f32 0.6931472, %v2348_v19 }
 0x24b   : > { %v2350_v6 = vpop.eup %2349  ;;  %v2020_v18 = vadd.f32 %v2019_v60, %v2006_v1  ;;  %v1995_v31 = vand.u32 2147483647, %v1975_v28 }
 0x24c   : > { %v2352_v7 = vpop.eup %2351  ;;  %v1979_v0 = vmul.f32 0.6931472, %v2350_v6  ;;  %v2009_v48 = vmul.f32 %v2198_v53, %v1994_v61  ;;  %v1998_v26 = vand.u32 2147483647, %v1981_v46 }
 0x24d   : > { %v2021_v52 = vadd.f32 %v2020_v18, %v1992_v24  ;;  %v1977_v14 = vmul.f32 0.6931472, %v2352_v7 }
 0x24e   : > { %v1997_v58 = vand.u32 2147483647, %v1979_v0  ;;  %v2013_v33 = vmul.f32 %v3194_v27, %v1998_v26 }
 0x24f   : > { %v2022_v34 = vadd.f32 %v2021_v52, %v1993_v42  ;;  %v1996_v15 = vand.u32 2147483647, %v1977_v14 }
 0x250   : > { %v2354_v63 = vpop.eup %2353  ;;  %v2012_v13 = vmul.f32 %v2198_v53, %v1997_v58 }
 0x251   : > { %v2356_v3 = vpop.eup %2355  ;;  %v1983_v38 = vmul.f32 0.6931472, %v2354_v63  ;;  %v2023_v30 = vadd.f32 %v2022_v34, %v2009_v48 }
 0x252   : > { %v1985_v21 = vmul.f32 0.6931472, %v2356_v3 }
 0x253   : > { %v2024_v11 = vadd.f32 %v2023_v30, %v1995_v31  ;;  %v1999_v39 = vand.u32 2147483647, %v1983_v38 }
 0x254   : > { %v2000_v32 = vand.u32 2147483647, %v1985_v21 }
 0x255   : > { %v2025_v17 = vadd.f32 %v2024_v11, %v1996_v15  ;;  %v2014_v10 = vmul.f32 %v3194_v27, %v1999_v39 }
 0x256   : > { %v2015_v51 = vmul.f32 %v2000_v32, %v1955_v23 }
 0x257   : > { %v2026_v22 = vadd.f32 %v2025_v17, %v2012_v13 }
 0x259   : > { %v2027_v50 = vadd.f32 %v2026_v22, %v2013_v33 }
 0x25b   : > { %v2028_v43 = vadd.f32 %v2027_v50, %v2014_v10 }
 0x25d   : > { %v2029_v9 = vadd.f32 %v2028_v43, %v2015_v51 }
 0x25f   : > { %2030 = vadd.xlane.f32.xlu1 %v2029_v9 }
 0x2c4   : > { %v1835_v25 = vpop.xlane.xlu0 %1834 }
 0x2c5   : > { %v1836_v41 = vrot.slane %v1835_v25, 4 }
 0x2c7   : > { %v1837_v55 = vadd.f32 %v1836_v41, %v1835_v25 }
 0x2c8   : > { %v1873_v20 = vpop.xlane.xlu0 %1872 }
 0x2c9   : > { %v1838_v5 = vrot.slane %v1837_v55, 2  ;;  %v1874_v2 = vrot.slane %v1873_v20, 4 }
 0x2cb   : > { %v1875_v49 = vadd.f32 %v1874_v2, %v1873_v20  ;;  %v1839_v47 = vadd.f32 %v1838_v5, %v1837_v55 }
 0x2cd   : > { %v1876_v53 = vrot.slane %v1875_v49, 2  ;;  %v1840_v44 = vrot.slane %v1839_v47, 1 }
 0x2cf   : > { %v1877_v29 = vadd.f32 %v1876_v53, %v1875_v49  ;;  %v1841_v35 = vadd.f32 %v1840_v44, %v1839_v47 }
 0x2d1   : > { %2208 = vpush %v1841_v35  ;;  %v1878_v27 = vrot.slane %v1877_v29, 1 }
 0x2d3   : > { %v1879_v54 = vadd.f32 %v1878_v27, %v1877_v29 }
 0x2d5   : > { %2210 = vpush %v1879_v54 }
 0x2e8   : > { %v2031_v4 = vpop.xlane.xlu1 %2030 }
 0x2e9   : > { %v2032_v37 = vrot.slane %v2031_v4, 4 }
 0x2eb   : > { %v2033_v16 = vadd.f32 %v2032_v37, %v2031_v4 }
 0x2ed   : > { %v2034_v8 = vrot.slane %v2033_v16, 2 }
 0x2ef   : > { %v2035_v62 = vadd.f32 %v2034_v8, %v2033_v16 }
 0x2f1   : > { %v2036_v40 = vrot.slane %v2035_v62, 1 }
 0x2f3   : > { %v2037_v12 = vadd.f32 %v2036_v40, %v2035_v62 }
 0x2f5   : > { %2212 = vpush %v2037_v12 }
 0x302   : > { %s2209_s18 = spop %2208 }
 0x303   : > { %v2042_v59 = vstv %s2209_s18 }
 0x304   : > { %v2043_v36 = vsel %vm2041_vm6, %v2042_v59, 0.0 }
 0x306   : > { %s2211_s20 = spop %2210 }
 0x307   : > { %v2045_v45 = vstv %s2211_s20 }
 0x308   : > { %v2046_v56 = vsel %vm2044_vm5, %v2045_v45, 0.0 }
 0x309   : > { %v2047_v1 = vadd.f32 %v2046_v56, %v2043_v36 }
 0x326   : > { %s2213_s23 = spop %2212 }
 0x327   : > { %s2039_s24 = smul.f32 0.5, %s2213_s23 }
 0x329   : > { %v2049_v60 = vstv %s2039_s24 }
 0x32a   : > { %v2050_v19 = vsel %vm2048_vm7, %v2049_v60, 0.0 }
 0x32b   : > { %v2051_v6 = vadd.f32 %v2050_v19, %v2047_v1 }
 0x32d   : > { %2058 = vst [vmem:[%s254_s29] sm:$0xff] %v2051_v6 }
 0x32e   : > { %2462 = shalt.err (!%p2459_p6)
}
 0x32f   : > { %s2463_s2 = scalar_lea.hbm %s2071_s27, 128  ;;  %s2467_s11 = scalar_lea.hbm %s3565_s3, 256 }
 0x330   : > { %p2464_p9 = scmp.ne.s32.totalorder %s2071_s27, %s2463_s2  ;;  %p2468_p3 = scmp.lt.s32.totalorder %s2071_s27, %s3565_s3 }
 0x331   : > { %p2469_p5 = scmp.lt.s32.totalorder %s2467_s11, %s2463_s2 }
 0x332   : > { %p2465_p12 = pnand %p2464_p9, %p2647_p0 }
 0x333   : > { %p2470_p1 = por %p2469_p5, %p2468_p3 }
 0x334   : > { %p2466_p13 = pneg %p2465_p12 }
 0x336   : > { %p2471_p4 = pnand %p2470_p1, %p2466_p13 }
 0x338   : > { %2474 = shalt.err (!%p2471_p4)
}
 0x339   : > { %2222 = dma.vmem_to_hbm [thread:$0]  (%p2647_p0), %s2074_s30, 128, %s2071_s27, %s2060_s5  }
 0x33a PF: > { %s2085_s26 = sand.u32 1, %s2517_s12   ;;  %p3616_p8 = scmp.ne.s32.totalorder %s3576_s21, 0 }
 0x33b   : > { %s2086_s18 = scalar_lea.sflag [#allocation6], %s2085_s26 }
 0x33c   : > { %p2236_p11 = pnand %p2191_p10, %p3616_p8 }
 0x33e   : > { %p2237_p7 = pneg %p2236_p11 }
 0x340   : > { %2512 = dma.done.wait (%p2237_p7), %s2086_s18, 128  }
 0x341   : > { %2514 = vsyncadd (%p2237_p7), %s2086_s18, 4294967168  ;;  %s22_s17 = sadd.s32 1, %s2537_s17   ;;  %s3617_s20 = sld [smem:[#allocation15_spill]] }
 0x342   : > { %p19_p2 = scmp.ge.s32.totalorder %s22_s17, 4   ;;  %s3618_s14 = sld [smem:[#allocation17_spill]] }
 0x343   : > { %s3619_s6 = sld [smem:[#allocation16_spill]]  ;;  %s3620_s12 = smov %s2521_s13 }
 0x344   : > { %s3622_s15 = smov %s2533_s16 }
 0x345   :  { %21 = sbr.rel (!%p19_p2) target bundleno = 11 (0xb), region = 104 }
 0x347   : > { %s3621_s13 = smov %s3617_s20 }
 0x349   : > { %s3623_s16 = smov %s3619_s6 }
 0x34a   :  { %2091 = vsyncpa [#allocation5], 1 }
 0x34b   :  { %2093 = vsyncpa [#allocation5 + $0x1], 1 }
 0x34c   :  { %2094 = vsyncpa [#allocation8], 1 }
 0x34d   :  { %2096 = vsyncpa [#allocation8 + $0x1], 1 }
 0x34e   :  { %2097 = vsyncpa [#allocation6], 1 }
 0x34f   :  { %2099 = vsyncpa [#allocation6 + $0x1], 1 }

</bundles_post_ra>
